<compile_context>
chip_gen: v6e
topology: v6e:2x2x1
jax: 0.10.0
libtpu: 0.0.40
codegen_flags: <defaults>
</compile_context>

<pallas_src>
import math

import jax
import jax.numpy as jnp
from jax.experimental import pallas as pl
from jax.experimental.pallas import tpu as pltpu


def _sigmoid(x):
    # Explicit exp-based sigmoid (EUP) — guaranteed Mosaic lowering.
    return 1.0 / (1.0 + jnp.exp(-x))


def _attn_lstm_kernel(x_ref, a_ref, wx_ref, wh_ref, wattn_ref, b_ref,
                      h_out_ref, h_sc, c_sc):
    # x_ref:    (Np, D)      current time-step inputs (T axis squeezed)
    # a_ref:    (Np, P, H)   projected CNN features, spatial P=16 on sublanes
    # wx_ref:   (D, 4H)  wh_ref/wattn_ref: (H, 4H)  b_ref: (1, 4H)
    # h_out_ref:(Np, H)      hidden state for this time step
    # h_sc/c_sc:(Np, H)      recurrent state carried across grid steps
    t = pl.program_id(0)
    H = h_sc.shape[1]
    inv_sqrt_h = 1.0 / math.sqrt(H)

    a = a_ref[...]                                     # (Np, P, H)

    @pl.when(t == 0)
    def _():
        h0 = jnp.mean(a, axis=1)                       # spatial mean -> (Np, H)
        h_sc[...] = h0
        c_sc[...] = h0

    prev_h = h_sc[...]                                 # (Np, H)
    prev_c = c_sc[...]                                 # (Np, H)

    # --- scaled dot-product attention (lane-dense layouts) ---
    # scores[n, p] = sum_h prev_h[n, h] * A[n, p, h]   (lane reduce over H)
    scores = jnp.sum(prev_h[:, None, :] * a, axis=2) * inv_sqrt_h   # (Np, P)
    scores = scores - jnp.max(scores, axis=1, keepdims=True)
    e = jnp.exp(scores)
    w = e / jnp.sum(e, axis=1, keepdims=True)                       # (Np, P)
    # attn[n, h] = sum_p A[n, p, h] * w[n, p]          (sublane reduce over P)
    attn = jnp.sum(a * w[:, :, None], axis=1)                       # (Np, H)

    # --- LSTM gates: three MXU matmuls with f32 accumulation ---
    gates = (
        jnp.dot(x_ref[...], wx_ref[...], preferred_element_type=jnp.float32)
        + jnp.dot(prev_h, wh_ref[...], preferred_element_type=jnp.float32)
        + jnp.dot(attn, wattn_ref[...], preferred_element_type=jnp.float32)
        + b_ref[...]                                                # (1, 4H) bcast
    )                                                               # (Np, 4H)

    i = _sigmoid(gates[:, 0 * H:1 * H])
    f = _sigmoid(gates[:, 1 * H:2 * H])
    o = _sigmoid(gates[:, 2 * H:3 * H])
    g = jnp.tanh(gates[:, 3 * H:4 * H])

    next_c = f * prev_c + i * g
    next_h = o * jnp.tanh(next_c)

    h_sc[...] = next_h
    c_sc[...] = next_c
    h_out_ref[...] = next_h.astype(h_out_ref.dtype)


def attention_lstm_forward(x, A, Wx, Wh, Wattn, b):
    """Pallas equivalent of AttentionLSTM.forward(x, A) -> hn of shape (N, T, H)."""
    N, T, D = x.shape
    _, H, sa, sb = A.shape
    P = sa * sb
    H4 = 4 * H
    assert Wx.shape == (D, H4) and Wh.shape == (H, H4) and Wattn.shape == (H, H4)

    # Pad batch to a sublane multiple (8) so every tile is (8k, 128m) aligned.
    Np = max(8, ((N + 7) // 8) * 8)
    x_p = jnp.zeros((Np, T, D), x.dtype).at[:N].set(x)
    A_p = jnp.zeros((Np, H, sa, sb), A.dtype).at[:N].set(A)

    # Layout plumbing in the wrapper (not the kernel):
    #   x  -> (T, Np, D)  so each grid step grabs one lane-dense (Np, D) tile
    #   A  -> (Np, P, H)  so H sits on lanes (lane-dense attention math)
    x_tm = jnp.transpose(x_p, (1, 0, 2))
    a_t = jnp.transpose(A_p.reshape(Np, H, P), (0, 2, 1))
    b2 = b.reshape(1, H4)

    h_out = pl.pallas_call(
        _attn_lstm_kernel,
        out_shape=jax.ShapeDtypeStruct((T, Np, H), jnp.float32),
        grid_spec=pltpu.PrefetchScalarGridSpec(
            num_scalar_prefetch=0,
            grid=(T,),
            in_specs=[
                pl.BlockSpec((None, Np, D), lambda t: (t, 0, 0)),   # x_t
                pl.BlockSpec((Np, P, H), lambda t: (0, 0, 0)),      # A (resident)
                pl.BlockSpec((D, H4), lambda t: (0, 0)),            # Wx (resident)
                pl.BlockSpec((H, H4), lambda t: (0, 0)),            # Wh (resident)
                pl.BlockSpec((H, H4), lambda t: (0, 0)),            # Wattn (resident)
                pl.BlockSpec((1, H4), lambda t: (0, 0)),            # bias
            ],
            out_specs=pl.BlockSpec((None, Np, H), lambda t: (t, 0, 0)),
            scratch_shapes=[
                pltpu.VMEM((Np, H), jnp.float32),   # h carry
                pltpu.VMEM((Np, H), jnp.float32),   # c carry
            ],
        ),
        compiler_params=pltpu.CompilerParams(
            dimension_semantics=("arbitrary",),      # sequential recurrence over T
        ),
    )(x_tm, a_t, Wx, Wh, Wattn, b2)

    return jnp.transpose(h_out, (1, 0, 2))[:N]       # (N, T, H)


def _reference_forward(x, A, Wx, Wh, Wattn, b):
    """Pure-JAX replica of the PyTorch module for verification."""
    N, T, D = x.shape
    H = A.shape[1]
    hp = jax.lax.Precision.HIGHEST
    A_flat = A.reshape(N, H, -1)
    h = jnp.mean(A_flat, axis=2)
    c = h
    hs = []
    for t in range(T):
        scores = jnp.einsum("nh,nhp->np", h, A_flat, precision=hp) / math.sqrt(H)
        w = jax.nn.softmax(scores, axis=1)
        attn = jnp.einsum("nhp,np->nh", A_flat, w, precision=hp)
        a = (jnp.dot(x[:, t], Wx, precision=hp)
             + jnp.dot(h, Wh, precision=hp)
             + jnp.dot(attn, Wattn, precision=hp)
             + b)
        i = jax.nn.sigmoid(a[:, 0 * H:1 * H])
        f = jax.nn.sigmoid(a[:, 1 * H:2 * H])
        o = jax.nn.sigmoid(a[:, 2 * H:3 * H])
        g = jnp.tanh(a[:, 3 * H:4 * H])
        c = f * c + i * g
        h = o * jnp.tanh(c)
        hs.append(h)
    return jnp.stack(hs, axis=1)


if __name__ == "__main__":
    # Small deterministic config. D and H chosen as 128 so all tiles are
    # lane-dense (per the performance review); batch/seq stay tiny.
    N, T, D, H = 2, 8, 128, 128

    key = jax.random.PRNGKey(0)
    kx, ka, kwx, kwh, kwa, kb = jax.random.split(key, 6)

    x = jax.random.normal(kx, (N, T, D), dtype=jnp.float32)
    A = jax.random.normal(ka, (N, H, 4, 4), dtype=jnp.float32)
    Wx = jax.random.normal(kwx, (D, 4 * H), dtype=jnp.float32) / math.sqrt(D)
    Wh = jax.random.normal(kwh, (H, 4 * H), dtype=jnp.float32) / math.sqrt(H)
    Wattn = jax.random.normal(kwa, (H, 4 * H), dtype=jnp.float32) / math.sqrt(H)
    b = 0.1 * jax.random.normal(kb, (4 * H,), dtype=jnp.float32)

    hn = attention_lstm_forward(x, A, Wx, Wh, Wattn, b)
    hn = jax.block_until_ready(hn)

    ref = _reference_forward(x, A, Wx, Wh, Wattn, b)
    assert hn.shape == (N, T, H)
    assert hn.dtype == jnp.float32
    max_err = float(jnp.max(jnp.abs(hn - ref)))
    assert jnp.allclose(hn, ref, atol=1e-2, rtol=1e-2), f"max|err|={max_err}"

    print("KERNEL_OK")
</pallas_src>

<mosaic_0001>
module attributes {stable_mosaic.version = 11 : i64} {
  func.func @_attn_lstm_kernel(%arg0: i32, %arg1: memref<1x8x128xf32, #tpu.memory_space<vmem>>, %arg2: memref<8x16x128xf32, #tpu.memory_space<vmem>>, %arg3: memref<128x512xf32, #tpu.memory_space<vmem>>, %arg4: memref<128x512xf32, #tpu.memory_space<vmem>>, %arg5: memref<128x512xf32, #tpu.memory_space<vmem>>, %arg6: memref<1x512xf32, #tpu.memory_space<vmem>>, %arg7: memref<1x8x128xf32, #tpu.memory_space<vmem>>, %arg8: memref<8x128xf32, #tpu.memory_space<vmem>>, %arg9: memref<8x128xf32, #tpu.memory_space<vmem>>) attributes {dimension_semantics = [#tpu.dimension_semantics<arbitrary>], iteration_bounds = array<i64: 8>, scalar_prefetch = 0 : i64, scratch_operands = 2 : i64, tpu.core_type = #tpu.core_type<tc>, window_params = [{transform_indices = @transform_0, window_bounds = array<i64: 1, 8, 128>}, {pipeline_mode = #tpu.pipeline_mode<synchronous>, transform_indices = @transform_1, window_bounds = array<i64: 8, 16, 128>}, {pipeline_mode = #tpu.pipeline_mode<synchronous>, transform_indices = @transform_2, window_bounds = array<i64: 128, 512>}, {pipeline_mode = #tpu.pipeline_mode<synchronous>, transform_indices = @transform_3, window_bounds = array<i64: 128, 512>}, {pipeline_mode = #tpu.pipeline_mode<synchronous>, transform_indices = @transform_4, window_bounds = array<i64: 128, 512>}, {pipeline_mode = #tpu.pipeline_mode<synchronous>, transform_indices = @transform_5, window_bounds = array<i64: 1, 512>}, {transform_indices = @transform_6, window_bounds = array<i64: 1, 8, 128>}]} {
    %c0 = arith.constant 0 : index
    %c0_0 = arith.constant 0 : index
    %c0_1 = arith.constant 0 : index
    %0 = vector.load %arg2[%c0, %c0_0, %c0_1] : memref<8x16x128xf32, #tpu.memory_space<vmem>>, vector<8x16x128xf32>
    %c0_i32 = arith.constant 0 : i32
    %1 = arith.cmpi eq, %arg0, %c0_i32 : i32
    %2 = arith.extui %1 : i1 to i32
    %c0_i32_2 = arith.constant 0 : i32
    %3 = arith.cmpi ne, %2, %c0_i32_2 : i32
    scf.if %3 {
      %cst_41 = arith.constant dense<0.000000e+00> : vector<8x128xf32>
      %74 = vector.multi_reduction <add>, %0, %cst_41 [1] : vector<8x16x128xf32> to vector<8x128xf32>
      %cst_42 = arith.constant 1.600000e+01 : f32
      %75 = vector.broadcast %cst_42 : f32 to vector<8x128xf32>
      %76 = arith.divf %74, %75 : vector<8x128xf32>
      %c0_43 = arith.constant 0 : index
      %c0_44 = arith.constant 0 : index
      %77 = vector.load %arg8[%c0_43, %c0_44] : memref<8x128xf32, #tpu.memory_space<vmem>>, vector<8x128xf32>
      tpu.vector_store %arg8[%c0_43, %c0_44], %76 {strides = array<i32>} : memref<8x128xf32, #tpu.memory_space<vmem>>, vector<8x128xf32>,
      %c0_45 = arith.constant 0 : index
      %c0_46 = arith.constant 0 : index
      %78 = vector.load %arg9[%c0_45, %c0_46] : memref<8x128xf32, #tpu.memory_space<vmem>>, vector<8x128xf32>
      tpu.vector_store %arg9[%c0_45, %c0_46], %76 {strides = array<i32>} : memref<8x128xf32, #tpu.memory_space<vmem>>, vector<8x128xf32>,
    } else {
    }
    %c0_3 = arith.constant 0 : index
    %c0_4 = arith.constant 0 : index
    %4 = vector.load %arg8[%c0_3, %c0_4] : memref<8x128xf32, #tpu.memory_space<vmem>>, vector<8x128xf32>
    %c0_5 = arith.constant 0 : index
    %c0_6 = arith.constant 0 : index
    %5 = vector.load %arg9[%c0_5, %c0_6] : memref<8x128xf32, #tpu.memory_space<vmem>>, vector<8x128xf32>
    %6 = vector.shape_cast %4 : vector<8x128xf32> to vector<8x1x128xf32>
    %7 = vector.broadcast %6 : vector<8x1x128xf32> to vector<8x16x128xf32>
    %8 = arith.mulf %7, %0 : vector<8x16x128xf32>
    %cst = arith.constant dense<0.000000e+00> : vector<8x16xf32>
    %9 = vector.multi_reduction <add>, %8, %cst [2] : vector<8x16x128xf32> to vector<8x16xf32>
    %cst_7 = arith.constant 0.0883883461 : f32
    %10 = vector.broadcast %cst_7 : f32 to vector<8x16xf32>
    %11 = arith.mulf %9, %10 : vector<8x16xf32>
    %cst_8 = arith.constant dense<0xFF800000> : vector<8xf32>
    %12 = vector.multi_reduction <maximumf>, %11, %cst_8 [1] : vector<8x16xf32> to vector<8xf32>
    %13 = vector.shape_cast %12 : vector<8xf32> to vector<8x1xf32>
    %14 = vector.broadcast %13 : vector<8x1xf32> to vector<8x16xf32>
    %15 = arith.subf %11, %14 : vector<8x16xf32>
    %16 = math.exp %15 : vector<8x16xf32>
    %cst_9 = arith.constant dense<0.000000e+00> : vector<8xf32>
    %17 = vector.multi_reduction <add>, %16, %cst_9 [1] : vector<8x16xf32> to vector<8xf32>
    %18 = vector.shape_cast %17 : vector<8xf32> to vector<8x1xf32>
    %19 = vector.broadcast %18 : vector<8x1xf32> to vector<8x16xf32>
    %20 = arith.divf %16, %19 : vector<8x16xf32>
    %21 = vector.shape_cast %20 : vector<8x16xf32> to vector<8x16x1xf32>
    %22 = vector.broadcast %21 : vector<8x16x1xf32> to vector<8x16x128xf32>
    %23 = arith.mulf %0, %22 : vector<8x16x128xf32>
    %cst_10 = arith.constant dense<0.000000e+00> : vector<8x128xf32>
    %24 = vector.multi_reduction <add>, %23, %cst_10 [1] : vector<8x16x128xf32> to vector<8x128xf32>
    %c0_11 = arith.constant 0 : index
    %c0_12 = arith.constant 0 : index
    %c0_13 = arith.constant 0 : index
    %25 = vector.load %arg1[%c0_11, %c0_12, %c0_13] : memref<1x8x128xf32, #tpu.memory_space<vmem>>, vector<1x8x128xf32>
    %26 = vector.shape_cast %25 : vector<1x8x128xf32> to vector<8x128xf32>
    %c0_14 = arith.constant 0 : index
    %c0_15 = arith.constant 0 : index
    %27 = vector.load %arg3[%c0_14, %c0_15] : memref<128x512xf32, #tpu.memory_space<vmem>>, vector<128x512xf32>
    %cst_16 = arith.constant dense<0.000000e+00> : vector<8x512xf32>
    %28 = tpu.matmul %26, %27, %cst_16 {dimension_numbers = #tpu.dot_dimension_numbers<[1], [0], [0], [1], [0, 0, 1, 1], [], []>} : vector<8x128xf32>, vector<128x512xf32>, vector<8x512xf32> -> vector<8x512xf32>
    %c0_17 = arith.constant 0 : index
    %c0_18 = arith.constant 0 : index
    %29 = vector.load %arg4[%c0_17, %c0_18] : memref<128x512xf32, #tpu.memory_space<vmem>>, vector<128x512xf32>
    %cst_19 = arith.constant dense<0.000000e+00> : vector<8x512xf32>
    %30 = tpu.matmul %4, %29, %cst_19 {dimension_numbers = #tpu.dot_dimension_numbers<[1], [0], [0], [1], [0, 0, 1, 1], [], []>} : vector<8x128xf32>, vector<128x512xf32>, vector<8x512xf32> -> vector<8x512xf32>
    %31 = arith.addf %28, %30 : vector<8x512xf32>
    %c0_20 = arith.constant 0 : index
    %c0_21 = arith.constant 0 : index
    %32 = vector.load %arg5[%c0_20, %c0_21] : memref<128x512xf32, #tpu.memory_space<vmem>>, vector<128x512xf32>
    %cst_22 = arith.constant dense<0.000000e+00> : vector<8x512xf32>
    %33 = tpu.matmul %24, %32, %cst_22 {dimension_numbers = #tpu.dot_dimension_numbers<[1], [0], [0], [1], [0, 0, 1, 1], [], []>} : vector<8x128xf32>, vector<128x512xf32>, vector<8x512xf32> -> vector<8x512xf32>
    %34 = arith.addf %31, %33 : vector<8x512xf32>
    %c0_23 = arith.constant 0 : index
    %c0_24 = arith.constant 0 : index
    %35 = vector.load %arg6[%c0_23, %c0_24] : memref<1x512xf32, #tpu.memory_space<vmem>>, vector<1x512xf32>
    %36 = vector.broadcast %35 : vector<1x512xf32> to vector<8x512xf32>
    %37 = arith.addf %34, %36 : vector<8x512xf32>
    %38 = vector.extract_strided_slice %37 {offsets = [0, 0], sizes = [8, 128], strides = [1, 1]} : vector<8x512xf32> to vector<8x128xf32>
    %cst_25 = arith.constant 0.000000e+00 : f32
    %39 = vector.broadcast %cst_25 : f32 to vector<8x128xf32>
    %40 = arith.subf %39, %38 : vector<8x128xf32>
    %41 = math.exp %40 : vector<8x128xf32>
    %cst_26 = arith.constant 1.000000e+00 : f32
    %42 = vector.broadcast %cst_26 : f32 to vector<8x128xf32>
    %43 = arith.addf %42, %41 : vector<8x128xf32>
    %cst_27 = arith.constant 1.000000e+00 : f32
    %44 = vector.broadcast %cst_27 : f32 to vector<8x128xf32>
    %45 = arith.divf %44, %43 : vector<8x128xf32>
    %46 = vector.extract_strided_slice %37 {offsets = [0, 128], sizes = [8, 128], strides = [1, 1]} : vector<8x512xf32> to vector<8x128xf32>
    %cst_28 = arith.constant 0.000000e+00 : f32
    %47 = vector.broadcast %cst_28 : f32 to vector<8x128xf32>
    %48 = arith.subf %47, %46 : vector<8x128xf32>
    %49 = math.exp %48 : vector<8x128xf32>
    %cst_29 = arith.constant 1.000000e+00 : f32
    %50 = vector.broadcast %cst_29 : f32 to vector<8x128xf32>
    %51 = arith.addf %50, %49 : vector<8x128xf32>
    %cst_30 = arith.constant 1.000000e+00 : f32
    %52 = vector.broadcast %cst_30 : f32 to vector<8x128xf32>
    %53 = arith.divf %52, %51 : vector<8x128xf32>
    %54 = vector.extract_strided_slice %37 {offsets = [0, 256], sizes = [8, 128], strides = [1, 1]} : vector<8x512xf32> to vector<8x128xf32>
    %cst_31 = arith.constant 0.000000e+00 : f32
    %55 = vector.broadcast %cst_31 : f32 to vector<8x128xf32>
    %56 = arith.subf %55, %54 : vector<8x128xf32>
    %57 = math.exp %56 : vector<8x128xf32>
    %cst_32 = arith.constant 1.000000e+00 : f32
    %58 = vector.broadcast %cst_32 : f32 to vector<8x128xf32>
    %59 = arith.addf %58, %57 : vector<8x128xf32>
    %cst_33 = arith.constant 1.000000e+00 : f32
    %60 = vector.broadcast %cst_33 : f32 to vector<8x128xf32>
    %61 = arith.divf %60, %59 : vector<8x128xf32>
    %62 = vector.extract_strided_slice %37 {offsets = [0, 384], sizes = [8, 128], strides = [1, 1]} : vector<8x512xf32> to vector<8x128xf32>
    %63 = math.tanh %62 : vector<8x128xf32>
    %64 = arith.mulf %53, %5 : vector<8x128xf32>
    %65 = arith.mulf %45, %63 : vector<8x128xf32>
    %66 = arith.addf %64, %65 : vector<8x128xf32>
    %67 = math.tanh %66 : vector<8x128xf32>
    %68 = arith.mulf %61, %67 : vector<8x128xf32>
    %c0_34 = arith.constant 0 : index
    %c0_35 = arith.constant 0 : index
    %69 = vector.load %arg8[%c0_34, %c0_35] : memref<8x128xf32, #tpu.memory_space<vmem>>, vector<8x128xf32>
    tpu.vector_store %arg8[%c0_34, %c0_35], %68 {strides = array<i32>} : memref<8x128xf32, #tpu.memory_space<vmem>>, vector<8x128xf32>,
    %c0_36 = arith.constant 0 : index
    %c0_37 = arith.constant 0 : index
    %70 = vector.load %arg9[%c0_36, %c0_37] : memref<8x128xf32, #tpu.memory_space<vmem>>, vector<8x128xf32>
    tpu.vector_store %arg9[%c0_36, %c0_37], %66 {strides = array<i32>} : memref<8x128xf32, #tpu.memory_space<vmem>>, vector<8x128xf32>,
    %c0_38 = arith.constant 0 : index
    %c0_39 = arith.constant 0 : index
    %c0_40 = arith.constant 0 : index
    %71 = vector.load %arg7[%c0_38, %c0_39, %c0_40] : memref<1x8x128xf32, #tpu.memory_space<vmem>>, vector<1x8x128xf32>
    %72 = vector.shape_cast %71 : vector<1x8x128xf32> to vector<8x128xf32>
    %73 = vector.shape_cast %68 : vector<8x128xf32> to vector<1x8x128xf32>
    tpu.vector_store %arg7[%c0_38, %c0_39, %c0_40], %73 {strides = array<i32>} : memref<1x8x128xf32, #tpu.memory_space<vmem>>, vector<1x8x128xf32>,
    return
  }
  func.func @transform_0(%arg0: i32) -> (i32, i32, i32) {
    %c0_i32 = arith.constant 0 : i32
    %c0_i32_0 = arith.constant 0 : i32
    %c0_i32_1 = arith.constant 0 : i32
    return %arg0, %c0_i32, %c0_i32_0 : i32, i32, i32
  }
  func.func @transform_1(%arg0: i32) -> (i32, i32, i32) {
    %c0_i32 = arith.constant 0 : i32
    %c0_i32_0 = arith.constant 0 : i32
    %c0_i32_1 = arith.constant 0 : i32
    %c0_i32_2 = arith.constant 0 : i32
    return %c0_i32, %c0_i32_0, %c0_i32_1 : i32, i32, i32
  }
  func.func @transform_2(%arg0: i32) -> (i32, i32) {
    %c0_i32 = arith.constant 0 : i32
    %c0_i32_0 = arith.constant 0 : i32
    %c0_i32_1 = arith.constant 0 : i32
    return %c0_i32, %c0_i32_0 : i32, i32
  }
  func.func @transform_3(%arg0: i32) -> (i32, i32) {
    %c0_i32 = arith.constant 0 : i32
    %c0_i32_0 = arith.constant 0 : i32
    %c0_i32_1 = arith.constant 0 : i32
    return %c0_i32, %c0_i32_0 : i32, i32
  }
  func.func @transform_4(%arg0: i32) -> (i32, i32) {
    %c0_i32 = arith.constant 0 : i32
    %c0_i32_0 = arith.constant 0 : i32
    %c0_i32_1 = arith.constant 0 : i32
    return %c0_i32, %c0_i32_0 : i32, i32
  }
  func.func @transform_5(%arg0: i32) -> (i32, i32) {
    %c0_i32 = arith.constant 0 : i32
    %c0_i32_0 = arith.constant 0 : i32
    %c0_i32_1 = arith.constant 0 : i32
    return %c0_i32, %c0_i32_0 : i32, i32
  }
  func.func @transform_6(%arg0: i32) -> (i32, i32, i32) {
    %c0_i32 = arith.constant 0 : i32
    %c0_i32_0 = arith.constant 0 : i32
    %c0_i32_1 = arith.constant 0 : i32
    return %arg0, %c0_i32, %c0_i32_0 : i32, i32, i32
  }
}

</mosaic_0001>

<bundles_post_ra>
// kernel: tpu_custom_call.1
= control target key start
LH: loop header
LB: loop body
LE: loop exit
PB: predicated region body
PF: predicated region fallthrough
CT: control target
= control target key end

     0   :  { %s2992_s0 = inlined_call_operand.hbm [shape: f32[8,8,128], index: 0, kind: input, shape index: {}]   ;;  %s2993_s1 = inlined_call_operand.hbm [shape: f32[8,16,128], index: 1, kind: input, shape index: {}]   ;;  %s2994_s2 = inlined_call_operand.hbm [shape: f32[128,512], index: 2, kind: input, shape index: {}]   ;;  %s2995_s3 = inlined_call_operand.hbm [shape: f32[128,512], index: 3, kind: input, shape index: {}]   ;;  %s2996_s4 = inlined_call_operand.hbm [shape: f32[128,512], index: 4, kind: input, shape index: {}]   ;;  %s2997_s5 = inlined_call_operand.vmem [shape: f32[1,512], index: 5, kind: input, shape index: {}]   ;;  %s2998_s6 = inlined_call_operand.hbm [shape: f32[8,8,128], index: 6, kind: output, shape index: {}]  }
   0x1   :  { %3007 = sst [smem:[#allocation18_spill]] %s2993_s1 }
   0x2   :  { %11 = vsyncpa [#allocation5], 0 }
   0x3   :  { %13 = vsyncpa [#allocation5 + $0x1], 0 }
   0x4   :  { %14 = vsyncpa [#allocation8], 0 }
   0x5   :  { %15 = vsyncpa [#allocation11], 0 }
   0x6   :  { %16 = vsyncpa [#allocation6], 0 }
   0x7   :  { %18 = vsyncpa [#allocation6 + $0x1], 0  ;;  %s2405_s21 = smov 0   ;;  %s2407_s22 = smov 0  }
   0x8   :  { %s2409_s23 = smov 0   ;;  %s2411_s24 = smov 0  }
   0x9 LB: > { %s2357_s25 = smov [#allocation7]   ;;  %s2426_s27 = sadd.s32 4294967295, %s2355_s24   ;;  %s2355_s24 = sphi %s2411_s24, %s3032_s24   ;;  %s2351_s23 = sphi %s2409_s23, %s3031_s23   ;;  %s2347_s22 = sphi %s2407_s22, %s3030_s22   ;;  %s2343_s21 = sphi %s2405_s21, %s3029_s21  }
   0xa   : > { %s198_s26 = sshll.u32 %s2357_s25, 4  ;;  %p1970_p0 = scmp.ge.s32.totalorder %s2355_s24, 1  ;;  %s199_s26 = int_to_ptr.vmem [resolvable:$true] %s198_s26 }
   0xb   : > { %p2999_p1 = scmp.eq.s32.totalorder %s2426_s27, 0  ;;  %p186_p2 = scmp.lt.s32.totalorder %s2355_s24, 9 }
   0xc   : > { %s2358_s30 = smov [#allocation10]   ;;  %s2359_s8 = smov [#allocation9]  }
   0xd   : > { %p2432_p4 = pnand %p1970_p0, %p186_p2  ;;  %s224_s7 = sshll.u32 %s2358_s30, 4  ;;  %s2444_s7 = int_to_ptr.vmem [resolvable:$true] %s224_s7 }
   0xe   : > { %s2446_s9 = sshll.u32 %s2359_s8, 4  ;;  %s2162_s10 = scalar_lea.vmem %s199_s26, 2048  ;;  %s212_s9 = int_to_ptr.vmem [resolvable:$true] %s2446_s9 }
   0xf   : > { %s3008_s28 = scalar_select %p2432_p4, 1, 0 }
  0x10   : > { %p2010_p5 = pneg %p2432_p4  ;;  %p2163_p8 = scmp.ne.s32.totalorder %s199_s26, %s2162_s10 }
  0x11   : > { %p2170_p11 = scmp.lt.s32.totalorder %s199_s26, %s199_s26  ;;  %p2171_p12 = scmp.lt.s32.totalorder %s2162_s10, %s2162_s10 }
  0x12   : > { %p2440_p6 = pnand %p2010_p5, %p2999_p1 }
  0x13   : > { %p2172_p13 = por %p2171_p12, %p2170_p11 }
  0x14   : > { %p2153_p7 = pneg %p2440_p6 }
  0x16   : > { %p2165_p9 = pnand %p2163_p8, %p2153_p7 }
  0x18   : > { %p2166_p10 = pneg %p2165_p9 }
  0x1a   : > { %p2173_p0 = pnand %p2172_p13, %p2166_p10 }
  0x1c   : > { %2176 = shalt.err (!%p2173_p0)
}
  0x1d   : > { %s2360_s11 = smov 128   ;;  %s2361_s12 = smov 8  }
  0x1e   : > { %s3010_s1 = sld [smem:[#allocation18_spill]]  ;;  %s2188_s15 = scalar_lea.vmem %s2444_s7, 8192 }
  0x1f   : > { %p2189_p2 = scmp.ne.s32.totalorder %s2444_s7, %s2188_s15  ;;  %p2196_p9 = scmp.lt.s32.totalorder %s2444_s7, %s2444_s7 }
  0x20   : > { %p2197_p10 = scmp.lt.s32.totalorder %s2188_s15, %s2188_s15 }
  0x21   : > { %p2191_p5 = pnand %p2189_p2, %p2153_p7 }
  0x22   : > { %p2198_p11 = por %p2197_p10, %p2196_p9 }
  0x23   : > { %p2192_p8 = pneg %p2191_p5 }
  0x24   : > { %2013 = dma.hbm_to_vmem [thread:$0]  (!%p2440_p6), %s3010_s1, 2048, %s199_s26, [#allocation8], %s2360_s11, %s2360_s11, %s2361_s12  }
  0x25   : > { %p2199_p12 = pnand %p2198_p11, %p2192_p8 }
  0x27   : > { %2202 = shalt.err (!%p2199_p12)
}
  0x28   : > { %s2362_s16 = smov 512   ;;  %s2363_s17 = smov 32  }
  0x29   : > { %2019 = dma.hbm_to_vmem [thread:$0]  (!%p2440_p6), %s2995_s3, 8192, %s2444_s7, [#allocation11], %s2362_s16, %s2362_s16, %s2363_s17  }
  0x2a   : > { %s2214_s20 = scalar_lea.vmem %s212_s9, 8192  ;;  %p2222_p5 = scmp.lt.s32.totalorder %s212_s9, %s212_s9 }
  0x2b   : > { %p2215_p13 = scmp.ne.s32.totalorder %s212_s9, %s2214_s20  ;;  %p2223_p8 = scmp.lt.s32.totalorder %s2214_s20, %s2214_s20 }
  0x2d   : > { %p2217_p0 = pnand %p2215_p13, %p2153_p7  ;;  %p2224_p9 = por %p2223_p8, %p2222_p5 }
  0x2f   : > { %p2218_p2 = pneg %p2217_p0 }
  0x31   : > { %p2225_p10 = pnand %p2224_p9, %p2218_p2 }
  0x33   : > { %2228 = shalt.err (!%p2225_p10)
}
  0x34   : > { %2016 = dma.hbm_to_vmem [thread:$0]  (!%p2440_p6), %s2994_s2, 8192, %s212_s9, [#allocation8], %s2362_s16, %s2362_s16, %s2363_s17  }
  0x35   : > { %s2364_s30 = smov [#allocation12]  }
  0x36   : > { %s237_s7 = sshll.u32 %s2364_s30, 4  ;;  %s238_s7 = int_to_ptr.vmem [resolvable:$true] %s237_s7 }
  0x37   : > { %s2240_s8 = scalar_lea.vmem %s238_s7, 8192  ;;  %p2248_p0 = scmp.lt.s32.totalorder %s238_s7, %s238_s7 }
  0x38   : > { %p2241_p11 = scmp.ne.s32.totalorder %s238_s7, %s2240_s8  ;;  %p2249_p5 = scmp.lt.s32.totalorder %s2240_s8, %s2240_s8 }
  0x3a   : > { %p2243_p12 = pnand %p2241_p11, %p2153_p7  ;;  %p2250_p2 = por %p2249_p5, %p2248_p0 }
  0x3c   : > { %p2244_p13 = pneg %p2243_p12 }
  0x3e   : > { %p2251_p8 = pnand %p2250_p2, %p2244_p13 }
  0x40   : > { %2254 = shalt.err (!%p2251_p8)
}
  0x41   : > { %2022 = dma.hbm_to_vmem [thread:$0]  (!%p2440_p6), %s2996_s4, 8192, %s238_s7, [#allocation11], %s2362_s16, %s2362_s16, %s2363_s17  }
  0x42   : > { %s1969_s9 = sadd.s32 4294967294, %s2355_s24   ;;  %s2490_s29 = sadd.s32 1, %s2355_s24  }
  0x43   : > { %s28_s12 = ssub.s32 %s2355_s24, %s2490_s29  ;;  %s31_s13 = sadd.s32 1, %s2351_s23 }
  0x44   : > { %p29_p7 = scmp.eq.s32.totalorder %s28_s12, 0  ;;  %p38_p9 = scmp.ne.s32.totalorder %s2351_s23, %s2347_s22 }
  0x45   : > { %p39_p10 = scmp.eq.s32.totalorder %s2355_s24, 0  ;;  %p44_p11 = scmp.ne.s32.totalorder %s2347_s22, %s2343_s21 }
  0x46   : > { %s2501_s14 = scalar_select %p29_p7, %s2351_s23, %s31_s13  }
  0x47   : > { %p2503_p12 = por %p39_p10, %p38_p9  ;;  %p2509_p6 = por %p2999_p1, %p44_p11 }
  0x48   : > { %p173_p13 = scmp.eq.s32.totalorder %s2426_s27, 7  ;;  %p179_p0 = scmp.eq.s32.totalorder %s1969_s9, 7 }
  0x49   : > { %s3012_s16 = scalar_select %p2509_p6, 1, 0 }
  0x4a   : > { %p2035_p5 = scmp.lt.s32.totalorder %s2355_s24, 8  ;;  %s254_s17 = sand.u32 1, %s2351_s23  }
  0x4b   : > { %p2516_p2 = por %p173_p13, %p38_p9  ;;  %p2520_p8 = por %p179_p0, %p44_p11 }
  0x4c   : > { %s1976_s20 = sshll.u32 %s254_s17, 3  ;;  %s1977_s25 = sshll.u32 %s2355_s24, 7 }
  0x4d   : > { %s3013_s18 = scalar_select %p2516_p2, 1, 0 }
  0x4e   : > { %s3014_s19 = scalar_select %p2520_p8, 1, 0 }
  0x4f   : > { %s2528_s7 = scalar_lea.hbm %s2992_s0, %s1977_s25  ;;  %s258_s8 = scalar_lea.vmem [#allocation4], %s1976_s20 }
  0x50   : > { %s265_s10 = sshll.u32 %s258_s8, 4  ;;  %p2532_p7 = pnand %p2035_p5, %p2503_p12  ;;  %s266_s10 = int_to_ptr.vmem [resolvable:$true] %s265_s10 }
  0x51   : > { %s255_s9 = scalar_lea.sflag [#allocation5], %s254_s17  ;;  %s2255_s12 = scalar_lea.hbm %s2528_s7, 128 }
  0x52   : > { %p2256_p9 = scmp.ne.s32.totalorder %s2528_s7, %s2255_s12  ;;  %p2257_p10 = pneg %p2532_p7 }
  0x53   : > { %s2260_s26 = scalar_lea.hbm %s2992_s0, 1024  ;;  %p2261_p0 = scmp.lt.s32.totalorder %s2528_s7, %s2992_s0 }
  0x54   : > { %p2258_p11 = pnand %p2257_p10, %p2256_p9  ;;  %p2262_p12 = scmp.lt.s32.totalorder %s2260_s26, %s2255_s12 }
  0x56   : > { %p2259_p13 = pneg %p2258_p11  ;;  %p2263_p5 = por %p2262_p12, %p2261_p0 }
  0x58   : > { %p2264_p3 = pnand %p2263_p5, %p2259_p13 }
  0x5a   : > { %2267 = shalt.err (!%p2264_p3)
}
  0x5b   : > { %s2268_s15 = scalar_lea.vmem %s266_s10, 128  ;;  %s2365_s17 = smov [#allocation4]  }
  0x5c   : > { %p2269_p1 = scmp.ne.s32.totalorder %s266_s10, %s2268_s15  ;;  %s2273_s8 = sshll.u32 %s2365_s17, 4  ;;  %s2274_s8 = int_to_ptr.vmem [resolvable:$false] %s2273_s8 }
  0x5d   : > { %s2275_s1 = scalar_lea.vmem %s2274_s8, 256  ;;  %p2276_p9 = scmp.lt.s32.totalorder %s266_s10, %s2274_s8 }
  0x5e   : > { %p2271_p8 = pnand %p2269_p1, %p2257_p10  ;;  %p2277_p11 = scmp.lt.s32.totalorder %s2275_s1, %s2268_s15 }
  0x60   : > { %p2272_p2 = pneg %p2271_p8  ;;  %p2278_p6 = por %p2277_p11, %p2276_p9 }
  0x62   : > { %p2279_p4 = pnand %p2278_p6, %p2272_p2 }
  0x64   : > { %2282 = shalt.err (!%p2279_p4)
}
  0x65   : > { %2026 = dma.hbm_to_vmem [thread:$0]  (!%p2532_p7), %s2528_s7, 128, %s266_s10, %s255_s9  }
  0x66   : > { %p3016_p13 = scmp.ne.s32.totalorder %s3008_s28, 0 }
  0x67   : > { %s2553_s12 = sand.u32 (!%p3016_p13), 1, %s2347_s22   ;;  %p3017_p1 = scmp.ne.s32.totalorder (!%p3016_p13), %s3012_s16, 0 }
  0x68   : > { %274 = sbr.rel (%p3016_p13) target bundleno = 1284 (0x504), region = 44  ;;  %s1979_s13 = sshll.u32 (!%p3016_p13), %s2553_s12, 3 }
  0x69   : > { %s277_s25 = scalar_lea.sflag (!%p3016_p13), [#allocation5], %s2553_s12  ;;  %s2557_s26 = scalar_lea.vmem (!%p3016_p13), [#allocation4], %s1979_s13 }
  0x6d   : > { %2326 = dma.done.wait (%p3017_p1), %s277_s25, 128  }
  0x6e   : > { %2328 = vsyncadd (%p3017_p1), %s277_s25, 4294967168  ;;  %p3018_p3 = scmp.eq.s32.totalorder %s2426_s27, 0 }
  0x70   : > { %2330 = dma.done.wait (%p3018_p3), [#allocation8], 10240   ;;  %p3019_p4 = pmov %p3018_p3 }
  0x71   : > { %p3020_p6 = pmov %p3018_p3 }
  0x72   : > { %2332 = vsyncadd (%p3019_p4), [#allocation8], 4294957056 }
  0x73   : > { %2334 = dma.done.wait (%p3020_p6), [#allocation11], 16384   ;;  %p3021_p2 = pmov %p3018_p3 }
  0x74   : > { %v2571_v0 = vld [vmem:[#allocation7] sm:$0xff]  ;;  %v2573_v1 = vld [vmem:[#allocation7 + $0x8] sm:$0xff]  ;;  %v2575_v2 = vld [vmem:[#allocation7 + $0x10] sm:$0xff]  ;;  %s2603_s1 = scalar_lea.vmem [#allocation13], %s1979_s13  ;;  %p3022_p8 = scmp.ne.s32.totalorder %s2426_s27, 0 }
  0x75   : > { %2336 = vsyncadd (%p3021_p2), [#allocation11], 4294950912  ;;  %v2577_v3 = vld [vmem:[#allocation7 + $0x18] sm:$0xff]  ;;  %v2579_v4 = vld [vmem:[#allocation7 + $0x20] sm:$0xff] }
  0x76   : > { %v2581_v5 = vld [vmem:[#allocation7 + $0x28] sm:$0xff]  ;;  %v2583_v6 = vld [vmem:[#allocation7 + $0x30] sm:$0xff]  ;;  %v2585_v7 = vld [vmem:[#allocation7 + $0x38] sm:$0xff]  ;;  %344 = sbr.rel (%p3022_p8) target bundleno = 147 (0x93), region = 68 }
  0x77   : > { %v2587_v8 = vld [vmem:[#allocation7 + $0x40] sm:$0xff]  ;;  %v2589_v9 = vld [vmem:[#allocation7 + $0x48] sm:$0xff]  ;;  %v2591_v10 = vld [vmem:[#allocation7 + $0x50] sm:$0xff] }
  0x78   : > { %v2593_v11 = vld [vmem:[#allocation7 + $0x58] sm:$0xff]  ;;  %v2595_v12 = vld [vmem:[#allocation7 + $0x60] sm:$0xff]  ;;  %v2597_v13 = vld [vmem:[#allocation7 + $0x68] sm:$0xff] }
  0x79   : > { %v2599_v14 = vld [vmem:[#allocation7 + $0x70] sm:$0xff]  ;;  %v2601_v15 = vld [vmem:[#allocation7 + $0x78] sm:$0xff] }
  0x7b   : > { %v345_v16 = vadd.f32 %v2573_v1, %v2571_v0  ;;  %v352_v17 = vadd.f32 %v2577_v3, %v2575_v2  ;;  %v359_v18 = vadd.f32 %v2581_v5, %v2579_v4  ;;  %v366_v19 = vadd.f32 %v2585_v7, %v2583_v6 }
  0x7c   : > { %v373_v20 = vadd.f32 %v2589_v9, %v2587_v8  ;;  %v380_v21 = vadd.f32 %v2593_v11, %v2591_v10  ;;  %v387_v22 = vadd.f32 %v2597_v13, %v2595_v12  ;;  %v394_v23 = vadd.f32 %v2601_v15, %v2599_v14 }
  0x7d   : > { %v346_v24 = vrot.slane %v345_v16, 4  ;;  %v353_v25 = vrot.slane %v352_v17, 4  ;;  %v360_v26 = vrot.slane %v359_v18, 4  ;;  %v367_v27 = vrot.slane %v366_v19, 4 }
  0x7e   : > { %v374_v28 = vrot.slane %v373_v20, 4  ;;  %v381_v29 = vrot.slane %v380_v21, 4  ;;  %v388_v30 = vrot.slane %v387_v22, 4  ;;  %v395_v31 = vrot.slane %v394_v23, 4 }
  0x7f   : > { %v347_v32 = vadd.f32 %v346_v24, %v345_v16  ;;  %v354_v33 = vadd.f32 %v353_v25, %v352_v17  ;;  %v361_v34 = vadd.f32 %v360_v26, %v359_v18  ;;  %v368_v35 = vadd.f32 %v367_v27, %v366_v19 }
  0x80   : > { %v375_v36 = vadd.f32 %v374_v28, %v373_v20  ;;  %v382_v37 = vadd.f32 %v381_v29, %v380_v21  ;;  %v389_v38 = vadd.f32 %v388_v30, %v387_v22  ;;  %v396_v39 = vadd.f32 %v395_v31, %v394_v23 }
  0x81   : > { %v348_v40 = vrot.slane %v347_v32, 2  ;;  %v355_v41 = vrot.slane %v354_v33, 2  ;;  %v362_v42 = vrot.slane %v361_v34, 2  ;;  %v369_v43 = vrot.slane %v368_v35, 2 }
  0x82   : > { %v376_v44 = vrot.slane %v375_v36, 2  ;;  %v383_v45 = vrot.slane %v382_v37, 2  ;;  %v390_v46 = vrot.slane %v389_v38, 2  ;;  %v397_v47 = vrot.slane %v396_v39, 2 }
  0x83   : > { %v349_v48 = vadd.f32 %v348_v40, %v347_v32  ;;  %v356_v49 = vadd.f32 %v355_v41, %v354_v33  ;;  %v363_v50 = vadd.f32 %v362_v42, %v361_v34  ;;  %v370_v51 = vadd.f32 %v369_v43, %v368_v35 }
  0x84   : > { %v377_v52 = vadd.f32 %v376_v44, %v375_v36  ;;  %v384_v53 = vadd.f32 %v383_v45, %v382_v37  ;;  %v391_v54 = vadd.f32 %v390_v46, %v389_v38  ;;  %v398_v55 = vadd.f32 %v397_v47, %v396_v39 }
  0x85   : > { %v350_v56 = vrot.slane %v349_v48, 1  ;;  %v357_v57 = vrot.slane %v356_v49, 1  ;;  %v364_v58 = vrot.slane %v363_v50, 1  ;;  %v371_v59 = vrot.slane %v370_v51, 1 }
  0x86   : > { %v378_v60 = vrot.slane %v377_v52, 1  ;;  %v385_v61 = vrot.slane %v384_v53, 1  ;;  %v392_v62 = vrot.slane %v391_v54, 1  ;;  %v399_v63 = vrot.slane %v398_v55, 1 }
  0x87   : > { %v351_v16 = vadd.f32 %v350_v56, %v349_v48  ;;  %v358_v17 = vadd.f32 %v357_v57, %v356_v49  ;;  %v365_v18 = vadd.f32 %v364_v58, %v363_v50  ;;  %v372_v19 = vadd.f32 %v371_v59, %v370_v51 }
  0x88   : > { %v379_v20 = vadd.f32 %v378_v60, %v377_v52  ;;  %v386_v21 = vadd.f32 %v385_v61, %v384_v53  ;;  %v393_v22 = vadd.f32 %v392_v62, %v391_v54  ;;  %v400_v26 = vadd.f32 %v399_v63, %v398_v55 }
  0x89   : > { %v402_v23 = vmul.f32 0.0625, %v351_v16  ;;  %v403_v24 = vmul.f32 0.0625, %v358_v17  ;;  %v404_v25 = vmul.f32 0.0625, %v365_v18  ;;  %v405_v27 = vmul.f32 0.0625, %v372_v19 }
  0x8a   : > { %v406_v28 = vmul.f32 0.0625, %v379_v20  ;;  %vm418_vm0 = vcmask 1041409   ;;  %vm420_vm1 = vcmask 1042434   ;;  %vm422_vm2 = vcmask 1043459  }
  0x8b   : > { %v407_v29 = vmul.f32 0.0625, %v386_v21  ;;  %v419_v30 = vsel %vm418_vm0, %v403_v24, %v402_v23  ;;  %vm424_vm3 = vcmask 1044484   ;;  %v408_v31 = vmul.f32 0.0625, %v393_v22 }
  0x8c   : > { %v421_v32 = vsel %vm420_vm1, %v404_v25, %v419_v30  ;;  %vm426_vm4 = vcmask 1045509   ;;  %v409_v33 = vmul.f32 0.0625, %v400_v26  ;;  %vm428_vm5 = vcmask 1046534  }
  0x8d   : > { %v423_v34 = vsel %vm422_vm2, %v405_v27, %v421_v32  ;;  %vm430_vm6 = vcmask 1047559  }
  0x8e   : > { %v425_v35 = vsel %vm424_vm3, %v406_v28, %v423_v34 }
  0x8f   : > { %v427_v36 = vsel %vm426_vm4, %v407_v29, %v425_v35 }
  0x90   : > { %v429_v37 = vsel %vm428_vm5, %v408_v31, %v427_v36 }
  0x91   : > { %v431_v38 = vsel %vm430_vm6, %v409_v33, %v429_v37 }
  0x92   : > { %433 = vst [vmem:[#allocation2] sm:$0xff] %v431_v38  ;;  %434 = vst [vmem:[#allocation3] sm:$0xff] %v431_v38 }
  0x93 PF: > { %v442_v40 = vlaneseq  ;;  %v2366_v41 = vmov 1966171168   ;;  %vm618_vm7 = vcmask 130112   ;;  %vm683_vm8 = vcmask 1041409   ;;  %s1987_s7 = sshll.u32 %s2426_s27, 7  ;;  %s1861_s10 = sshll.u32 %s2603_s1, 4  ;;  %s1862_s10 = int_to_ptr.vmem [resolvable:$true] %s1861_s10 }
  0x94   : > { %v440_v42 = vunpack.c.l.s4 %v2366_v41  ;;  %vm685_vm9 = vcmask 1042434   ;;  %vm687_vm10 = vcmask 1043459   ;;  %vm689_vm11 = vcmask 1044484   ;;  %s2955_s20 = scalar_lea.hbm %s2998_s6, %s1987_s7  ;;  %s1848_s30 = scalar_lea.sflag [#allocation6], %s2553_s12 }
  0x95   : > { %v2625_v43 = vshrl.u32 %v442_v40, 7  ;;  %v608_v44 = vand.u32 127, %v442_v40  ;;  %vm691_vm12 = vcmask 1045509   ;;  %vm693_vm13 = vcmask 1046534   ;;  %s2283_s15 = scalar_lea.vmem %s1862_s10, 128  ;;  %p3027_p10 = scmp.ne.s32.totalorder %s3013_s18, 0 }
  0x96   : > { %v441_v45 = vunpack.c.0.s8 %v440_v42  ;;  %vm695_vm14 = vcmask 1047559   ;;  %vm698_vm15 = vcmask 130048   ;;  %p2284_p7 = scmp.ne.s32.totalorder %s1862_s10, %s2283_s15  ;;  %s2369_s17 = smov [#allocation13]  }
  0x97   : > { %v2630_v47 = vsub.s32 %v608_v44, %v2625_v43  ;;  %v613_v48 = vadd.s32 4294967288, %v608_v44  ;;  %v2638_v52 = vsub.s32 0, %v2625_v43  ;;  %s2287_s27 = sshll.u32 %s2369_s17, 4  ;;  %s2288_s27 = int_to_ptr.vmem [resolvable:$false] %s2287_s27 }
  0x98   : > { %v444_v49 = vsub.s32 %v441_v45, %v2625_v43  ;;  %p2285_p0 = pnand %p2284_p7, %p3027_p10  ;;  %s2289_s8 = scalar_lea.vmem %s2288_s27, 256 }
  0x99   : > { %v2623_v39 = vld [vmem:[#allocation2] sm:$0xff]  ;;  %v2634_v50 = vsub.s32 %v613_v48, %v2625_v43  ;;  %p2290_p5 = scmp.lt.s32.totalorder %s1862_s10, %s2288_s27  ;;  %p2291_p9 = scmp.lt.s32.totalorder %s2289_s8, %s2283_s15 }
  0x9a   : > { %v438_v46 = vcombine.high %v2623_v39, %v2623_v39  ;;  %v445_v51 = vrot.slane %v2623_v39, %v444_v49  ;;  %p2286_p12 = pneg %p2285_p0 }
  0x9b   : > { %p2292_p11 = por %p2291_p9, %p2290_p5 }
  0x9c   : > { %v452_v53 = vrot.slane %v438_v46, %v444_v49  ;;  %v461_v54 = vrot.slane %v445_v51, %v444_v49  ;;  %v453_v56 = vcombine.high %v445_v51, %v445_v51 }
  0x9d   : > { %p2293_p13 = pnand %p2292_p11, %p2286_p12 }
  0x9e   : > { %v468_v55 = vrot.slane %v452_v53, %v444_v49  ;;  %v490_v57 = vrot.slane %v461_v54, %v2638_v52  ;;  %v475_v59 = vrot.slane %v453_v56, %v444_v49  ;;  %v483_v17 = vcombine.high %v461_v54, %v461_v54 }
  0x9f   : > { %v454_v19 = vcombine.high %v452_v53, %v452_v53 }
  0xa0   : > { %v506_v58 = vrot.slane %v468_v55, %v2638_v52  ;;  %v527_v60 = vmul.f32 %v490_v57, %v2571_v0  ;;  %v494_v62 = vrot.slane %v475_v59, %v2638_v52  ;;  %v528_v63 = vmul.f32 %v490_v57, %v2573_v1 }
  0xa1   : > { %v498_v21 = vrot.slane %v483_v17, %v2638_v52  ;;  %v485_v22 = vcombine.high %v475_v59, %v475_v59  ;;  %v482_v23 = vrot.slane %v454_v19, %v444_v49  ;;  %v484_v27 = vcombine.high %v468_v55, %v468_v55 }
  0xa2   : > { %v536_v61 = vmul.f32 %v506_v58, %v2589_v9  ;;  %543 = vadd.xlane.f32.xlu0 %v527_v60  ;;  %v529_v16 = vmul.f32 %v494_v62, %v2575_v2  ;;  %v535_v18 = vmul.f32 %v506_v58, %v2587_v8  ;;  %v530_v20 = vmul.f32 %v494_v62, %v2577_v3 }
  0xa3   : > { %v532_v24 = vmul.f32 %v498_v21, %v2581_v5  ;;  %v531_v25 = vmul.f32 %v498_v21, %v2579_v4  ;;  %v502_v26 = vrot.slane %v485_v22, %v2638_v52  ;;  %v510_v30 = vrot.slane %v482_v23, %v2638_v52 }
  0xa4   : > { %561 = vadd.xlane.f32.xlu1 %v536_v61  ;;  %v514_v31 = vrot.slane %v484_v27, %v2638_v52  ;;  %v486_v34 = vcombine.high %v482_v23, %v482_v23 }
  0xa5   : > { %v534_v28 = vmul.f32 %v502_v26, %v2585_v7  ;;  %v533_v29 = vmul.f32 %v502_v26, %v2583_v6  ;;  %v538_v32 = vmul.f32 %v510_v30, %v2593_v11  ;;  %v537_v33 = vmul.f32 %v510_v30, %v2591_v10 }
  0xa6   : > { %545 = vadd.xlane.f32.xlu0 %v528_v63  ;;  %v540_v35 = vmul.f32 %v514_v31, %v2597_v13  ;;  %v539_v36 = vmul.f32 %v514_v31, %v2595_v12  ;;  %v518_v37 = vrot.slane %v486_v34, %v2638_v52 }
  0xa8   : > { %547 = vadd.xlane.f32.xlu1 %v529_v16  ;;  %v542_v38 = vmul.f32 %v518_v37, %v2601_v15  ;;  %v541_v40 = vmul.f32 %v518_v37, %v2599_v14 }
  0xaa   : > { %559 = vadd.xlane.f32.xlu0 %v535_v18 }
  0xac   : > { %549 = vadd.xlane.f32.xlu1 %v530_v20 }
  0xae   : > { %551 = vadd.xlane.f32.xlu0 %v531_v25 }
  0xb0   : > { %553 = vadd.xlane.f32.xlu1 %v532_v24 }
  0xb2   : > { %555 = vadd.xlane.f32.xlu0 %v533_v29 }
  0xb4   : > { %557 = vadd.xlane.f32.xlu1 %v534_v28 }
  0xb6   : > { %563 = vadd.xlane.f32.xlu0 %v537_v33 }
  0xb8   : > { %565 = vadd.xlane.f32.xlu1 %v538_v32 }
  0xba   : > { %567 = vadd.xlane.f32.xlu0 %v539_v36 }
  0xbc   : > { %569 = vadd.xlane.f32.xlu1 %v540_v35 }
  0xbe   : > { %571 = vadd.xlane.f32.xlu0 %v541_v40 }
  0xc0   : > { %573 = vadd.xlane.f32.xlu1 %v542_v38 }
 0x12b   : > { %v544_v41 = vpop.xlane.xlu0 %543 }
 0x12c   : > { %v2678_v62 = vmul.f32 0.088388346, %v544_v41 }
 0x12d   : > { %v562_v42 = vpop.xlane.xlu1 %561 }
 0x12e   : > { %v612_v26 = vrot.slane %v2678_v62, %v2630_v47  ;;  %v2703_v29 = vmul.f32 0.088388346, %v562_v42 }
 0x12f   : > { %v546_v44 = vpop.xlane.xlu0 %545 }
 0x130   : > { %v2664_v53 = vmul.f32 0.088388346, %v546_v44 }
 0x131   : > { %v548_v45 = vpop.xlane.xlu1 %547 }
 0x132   : > { %v2672_v59 = vmul.f32 0.088388346, %v548_v45  ;;  %v617_v63 = vrot.slane %v2664_v53, %v2634_v50 }
 0x133   : > { %v560_v48 = vpop.xlane.xlu0 %559 }
 0x134   : > { %v623_v23 = vrot.slane %v2672_v59, %v2630_v47  ;;  %v2700_v27 = vmul.f32 0.088388346, %v560_v48  ;;  %v619_v30 = vsel %vm618_vm7, %v617_v63, %v612_v26 }
 0x135   : > { %v550_v46 = vpop.xlane.xlu1 %549 }
 0x136   : > { %v2666_v54 = vmul.f32 0.088388346, %v550_v46  ;;  %v650_v41 = vrot.slane %v2700_v27, %v2630_v47  ;;  %v654_v46 = vrot.slane %v2703_v29, %v2634_v50 }
 0x137   : > { %v552_v51 = vpop.xlane.xlu0 %551 }
 0x138   : > { %v2670_v56 = vmul.f32 0.088388346, %v552_v51  ;;  %v627_v16 = vrot.slane %v2666_v54, %v2634_v50 }
 0x139   : > { %v554_v49 = vpop.xlane.xlu1 %553 }
 0x13a   : > { %v2668_v55 = vmul.f32 0.088388346, %v554_v49  ;;  %v632_v18 = vrot.slane %v2670_v56, %v2630_v47  ;;  %v628_v28 = vsel %vm618_vm7, %v627_v16, %v623_v23  ;;  %v655_v16 = vsel %vm618_vm7, %v654_v46, %v650_v41 }
 0x13b   : > { %v556_v58 = vpop.xlane.xlu0 %555  ;;  %v684_v40 = vsel %vm683_vm8, %v628_v28, %v619_v30  ;;  %v2367_v30 = vmov 0   ;;  %v2750_v41 = vsub.s32 2, %v2625_v43 }
 0x13c   : > { %v2676_v61 = vmul.f32 0.088388346, %v556_v58  ;;  %v636_v17 = vrot.slane %v2668_v55, %v2634_v50  ;;  %2085 = vset.pattern.permute.xlu0 %v2367_v30  ;;  %2084 = vset.pattern.permute.xlu1 %v2367_v30 }
 0x13d   : > { %v558_v57 = vpop.xlane.xlu1 %557 }
 0x13e   : > { %v2674_v60 = vmul.f32 0.088388346, %v558_v57  ;;  %v641_v20 = vrot.slane %v2676_v61, %v2630_v47  ;;  %v637_v31 = vsel %vm618_vm7, %v636_v17, %v632_v18 }
 0x13f   : > { %v564_v22 = vpop.xlane.xlu0 %563  ;;  %v686_v42 = vsel %vm685_vm9, %v637_v31, %v684_v40  ;;  %v2742_v31 = vsub.s32 1, %v2625_v43 }
 0x140   : > { %v645_v19 = vrot.slane %v2674_v60, %v2634_v50  ;;  %v2696_v25 = vmul.f32 0.088388346, %v564_v22 }
 0x141   : > { %v566_v21 = vpop.xlane.xlu1 %565 }
 0x142   : > { %v2694_v24 = vmul.f32 0.088388346, %v566_v21  ;;  %v646_v32 = vsel %vm618_vm7, %v645_v19, %v641_v20  ;;  %v659_v36 = vrot.slane %v2696_v25, %v2630_v47 }
 0x143   : > { %v568_v34 = vpop.xlane.xlu0 %567  ;;  %v688_v48 = vsel %vm687_vm10, %v646_v32, %v686_v42 }
 0x144   : > { %v663_v35 = vrot.slane %v2694_v24, %v2634_v50  ;;  %v2714_v38 = vmul.f32 0.088388346, %v568_v34  ;;  %v690_v20 = vsel %vm689_vm11, %v655_v16, %v688_v48  ;;  %v2766_v16 = vsub.s32 3, %v2625_v43 }
 0x145   : > { %v570_v33 = vpop.xlane.xlu1 %569 }
 0x146   : > { %v2712_v37 = vmul.f32 0.088388346, %v570_v33  ;;  %v668_v45 = vrot.slane %v2714_v38, %v2630_v47  ;;  %v664_v57 = vsel %vm618_vm7, %v663_v35, %v659_v36  ;;  %v3004_v35 = vsub.s32 5, %v2625_v43 }
 0x147   : > { %v572_v51 = vpop.xlane.xlu0 %571  ;;  %v692_v21 = vsel %vm691_vm12, %v664_v57, %v690_v20 }
 0x148   : > { %v672_v44 = vrot.slane %v2712_v37, %v2634_v50  ;;  %v589_v63 = vmul.f32 0.088388346, %v572_v51 }
 0x149   : > { %v574_v49 = vpop.xlane.xlu1 %573 }
 0x14a   : > { %v2728_v58 = vmul.f32 0.088388346, %v574_v49  ;;  %v673_v17 = vsel %vm618_vm7, %v672_v44, %v668_v45  ;;  %v677_v19 = vrot.slane %v589_v63, %v2630_v47  ;;  %v3003_v44 = vsub.s32 6, %v2625_v43 }
 0x14b   : > { %v694_v23 = vsel %vm693_vm13, %v673_v17, %v692_v21 }
 0x14c   : > { %v681_v18 = vrot.slane %v2728_v58, %v2634_v50 }
 0x14e   : > { %v682_v22 = vsel %vm618_vm7, %v681_v18, %v677_v19 }
 0x14f   : > { %v696_v26 = vsel %vm695_vm14, %v682_v22, %v694_v23 }
 0x150   : > { %v699_v28 = vsel %vm698_vm15, %v696_v26, -inf }
 0x151   : > { %700 = vmax.xlane.f32.xlu0 %v699_v28  ;;  %v3006_v28 = vsub.s32 4, %v2625_v43 }
 0x1da   : > { %v701_v32 = vpop.xlane.xlu0 %700 }
 0x1db   : > { %v706_v33 = vrot.slane %v701_v32, %v2638_v52  ;;  %v710_v34 = vrot.slane %v701_v32, %v2742_v31  ;;  %v2756_v45 = vrot.slane %v701_v32, %v3004_v35  ;;  %v714_v49 = vrot.slane %v701_v32, %v2750_v41 }
 0x1dc   : > { %v718_v21 = vrot.slane %v701_v32, %v2766_v16 }
 0x1dd   : > { %v743_v36 = vsub.f32 %v2678_v62, %v706_v33  ;;  %v744_v40 = vsub.f32 %v2664_v53, %v706_v33  ;;  %v745_v42 = vsub.f32 %v2672_v59, %v710_v34  ;;  %v746_v51 = vsub.f32 %v2666_v54, %v710_v34 }
 0x1de   : > { %v3005_v53 = vsub.s32 7, %v2625_v43  ;;  %v730_v59 = vrot.slane %v701_v32, %v3003_v44  ;;  %v753_v57 = vsub.f32 %v2696_v25, %v2756_v45  ;;  %v747_v17 = vsub.f32 %v2670_v56, %v714_v49 }
 0x1df   : > { %v759_v46 = vmul.f32 1.442695, %v743_v36  ;;  %v761_v48 = vmul.f32 1.442695, %v744_v40  ;;  %v763_v62 = vmul.f32 1.442695, %v745_v42  ;;  %v748_v22 = vsub.f32 %v2668_v55, %v714_v49 }
 0x1e0   : > { %v765_v18 = vmul.f32 1.442695, %v746_v51  ;;  %v734_v54 = vrot.slane %v701_v32, %v3005_v53  ;;  %v755_v19 = vsub.f32 %v2714_v38, %v730_v59  ;;  %v779_v20 = vmul.f32 1.442695, %v753_v57 }
 0x1e1   : > { %2087 = vpow2.f32 %v759_v46  ;;  %v767_v23 = vmul.f32 1.442695, %v747_v17  ;;  %v749_v56 = vsub.f32 %v2676_v61, %v718_v21  ;;  %v769_v30 = vmul.f32 1.442695, %v748_v22 }
 0x1e2   : > { %2089 = vpow2.f32 %v761_v48  ;;  %v757_v25 = vsub.f32 %v589_v63, %v734_v54  ;;  %v783_v26 = vmul.f32 1.442695, %v755_v19  ;;  %v722_v55 = vrot.slane %v701_v32, %v3006_v28 }
 0x1e3   : > { %2091 = vpow2.f32 %v763_v62  ;;  %v750_v63 = vsub.f32 %v2674_v60, %v718_v21  ;;  %v771_v36 = vmul.f32 1.442695, %v749_v56  ;;  %v756_v17 = vsub.f32 %v2712_v37, %v730_v59 }
 0x1e4   : > { %2093 = vpow2.f32 %v765_v18  ;;  %v787_v38 = vmul.f32 1.442695, %v757_v25  ;;  %v751_v40 = vsub.f32 %v2700_v27, %v722_v55  ;;  %v752_v32 = vsub.f32 %v2703_v29, %v722_v55 }
 0x1e5   : > { %2095 = vpow2.f32 %v779_v20  ;;  %v773_v42 = vmul.f32 1.442695, %v750_v63  ;;  %v754_v27 = vsub.f32 %v2694_v24, %v2756_v45  ;;  %v758_v24 = vsub.f32 %v2728_v58, %v734_v54 }
 0x1e6   : > { %2097 = vpow2.f32 %v767_v23  ;;  %v775_v60 = vmul.f32 1.442695, %v751_v40  ;;  %v777_v62 = vmul.f32 1.442695, %v752_v32  ;;  %v785_v45 = vmul.f32 1.442695, %v756_v17 }
 0x1e7   : > { %2099 = vpow2.f32 %v783_v26  ;;  %v781_v18 = vmul.f32 1.442695, %v754_v27  ;;  %v789_v21 = vmul.f32 1.442695, %v758_v24 }
 0x1e8   : > { %2101 = vpow2.f32 %v769_v30 }
 0x1e9   : > { %2103 = vpow2.f32 %v787_v38 }
 0x1ea   : > { %2105 = vpow2.f32 %v771_v36 }
 0x1eb   : > { %2107 = vpow2.f32 %v773_v42 }
 0x1ec   : > { %2109 = vpow2.f32 %v775_v60 }
 0x1ed   : > { %2111 = vpow2.f32 %v777_v62 }
 0x1ee   : > { %v2776_v33 = vpop.eup %2087  ;;  %2113 = vpow2.f32 %v781_v18 }
 0x1ef   : > { %v2778_v34 = vpop.eup %2089  ;;  %808 = vperm.xlu1 %2084, %v2776_v33   ;;  %2115 = vpow2.f32 %v785_v45 }
 0x1f0   : > { %811 = vperm.xlu0 %2085, %v2778_v34   ;;  %v2785_v61 = vpop.eup %2091  ;;  %2117 = vpow2.f32 %v789_v21 }
 0x1f1   : > { %v2789_v46 = vpop.eup %2093 }
 0x1f2   : > { %v2792_v48 = vpop.eup %2095 }
 0x1f3   : > { %814 = vperm.xlu1 %2084, %v2785_v61   ;;  %v2796_v49 = vpop.eup %2097 }
 0x1f4   : > { %838 = vperm.xlu0 %2085, %v2792_v48   ;;  %v2799_v51 = vpop.eup %2099 }
 0x1f5   : > { %v2804_v57 = vpop.eup %2101 }
 0x1f6   : > { %v2807_v29 = vpop.eup %2103 }
 0x1f7   : > { %817 = vperm.xlu1 %2084, %v2789_v46   ;;  %v2811_v19 = vpop.eup %2105 }
 0x1f8   : > { %844 = vperm.xlu0 %2085, %v2799_v51   ;;  %v2815_v20 = vpop.eup %2107 }
 0x1f9   : > { %v2818_v22 = vpop.eup %2109 }
 0x1fa   : > { %v2821_v37 = vpop.eup %2111 }
 0x1fb   : > { %820 = vperm.xlu1 %2084, %v2796_v49   ;;  %v2824_v59 = vpop.eup %2113 }
 0x1fc   : > { %850 = vperm.xlu0 %2085, %v2807_v29   ;;  %v2827_v58 = vpop.eup %2115 }
 0x1fd   : > { %v2830_v54 = vpop.eup %2117 }
 0x1ff   : > { %823 = vperm.xlu1 %2084, %v2804_v57  }
 0x203   : > { %826 = vperm.xlu1 %2084, %v2811_v19  }
 0x207   : > { %829 = vperm.xlu1 %2084, %v2815_v20  }
 0x20b   : > { %832 = vperm.xlu1 %2084, %v2818_v22  }
 0x20f   : > { %835 = vperm.xlu1 %2084, %v2821_v37  }
 0x213   : > { %841 = vperm.xlu1 %2084, %v2824_v59  }
 0x217   : > { %847 = vperm.xlu1 %2084, %v2827_v58  }
 0x21b   : > { %853 = vperm.xlu1 %2084, %v2830_v54  }
 0x26a   : > { %v809_v23 = vpop.permute.xlu1 %808 }
 0x26b   : > { %v812_v55 = vpop.permute.xlu0 %811  ;;  %v858_v18 = vrot.slane %v809_v23, %v2630_v47 }
 0x26c   : > { %v862_v17 = vrot.slane %v812_v55, %v2634_v50 }
 0x26e   : > { %v815_v25 = vpop.permute.xlu1 %814  ;;  %v863_v23 = vsel %vm618_vm7, %v862_v17, %v858_v18 }
 0x26f   : > { %v839_v40 = vpop.permute.xlu0 %838  ;;  %v867_v24 = vrot.slane %v815_v25, %v2630_v47 }
 0x270   : > { %v903_v25 = vrot.slane %v839_v40, %v2630_v47 }
 0x272   : > { %v818_v26 = vpop.permute.xlu1 %817 }
 0x273   : > { %v871_v32 = vrot.slane %v818_v26, %v2634_v50  ;;  %v845_v60 = vpop.permute.xlu0 %844 }
 0x275   : > { %v872_v35 = vsel %vm618_vm7, %v871_v32, %v867_v24 }
 0x276   : > { %v821_v56 = vpop.permute.xlu1 %820  ;;  %v927_v32 = vsel %vm683_vm8, %v872_v35, %v863_v23  ;;  %v2368_v23 = vmov 0.0  }
 0x277   : > { %v876_v21 = vrot.slane %v821_v56, %v2630_v47  ;;  %1348 = vmatprep.mubr.f32.mxu0 %v2368_v23  ;;  %1419 = vmatprep.mubr.f32.mxu1 %v2368_v23 }
 0x27a   : > { %v824_v30 = vpop.permute.xlu1 %823 }
 0x27b   : > { %v880_v27 = vrot.slane %v824_v30, %v2634_v50 }
 0x27d   : > { %v881_v30 = vsel %vm618_vm7, %v880_v27, %v876_v21 }
 0x27e   : > { %v827_v38 = vpop.permute.xlu1 %826  ;;  %v928_v27 = vsel %vm685_vm9, %v881_v30, %v927_v32  ;;  %v1280_v30 = vld [vmem:[#allocation10 + $0x1e0] sm:$0xff] }
 0x27f   : > { %v885_v26 = vrot.slane %v827_v38, %v2630_v47  ;;  %v851_v38 = vpop.permute.xlu0 %850  ;;  %v1264_v32 = vld [vmem:[#allocation10 + $0x160] sm:$0xff] }
 0x280   : > { %v921_v18 = vrot.slane %v851_v38, %v2630_v47  ;;  %v1283_v38 = vld [vmem:[#allocation10 + $0x1f8] sm:$0xff] }
 0x281   : > { %1355 = vmatprep.subr.mxu1 %v1283_v38  ;;  %v1240_v38 = vld [vmem:[#allocation10 + $0xa0] sm:$0xff] }
 0x282   : > { %v830_v63 = vpop.permute.xlu1 %829 }
 0x283   : > { %v889_v45 = vrot.slane %v830_v63, %v2634_v50 }
 0x285   : > { %v890_v63 = vsel %vm618_vm7, %v889_v45, %v885_v26  ;;  %v1281_v26 = vld [vmem:[#allocation10 + $0x1e8] sm:$0xff] }
 0x286   : > { %v833_v36 = vpop.permute.xlu1 %832  ;;  %v929_v24 = vsel %vm687_vm10, %v890_v63, %v928_v27  ;;  %1284 = vmatprep.subr.mxu0 %v1281_v26  ;;  %v1269_v63 = vld [vmem:[#allocation10 + $0x188] sm:$0xff] }
 0x287   : > { %v894_v55 = vrot.slane %v833_v36, %v2630_v47  ;;  %1285 = vmatpush1.msra.mxu0 %v1280_v30  ;;  %v1261_v27 = vld [vmem:[#allocation10 + $0x148] sm:$0xff]  ;;  %v1266_v30 = vld [vmem:[#allocation10 + $0x170] sm:$0xff] }
 0x288   : > { %v1249_v26 = vld [vmem:[#allocation10 + $0xe8] sm:$0xff] }
 0x28a   : > { %v836_v42 = vpop.permute.xlu1 %835 }
 0x28b   : > { %v898_v44 = vrot.slane %v836_v42, %v2634_v50  ;;  %v912_v42 = vrot.slane %v845_v60, %v2630_v47  ;;  %v1276_v47 = vld [vmem:[#allocation10 + $0x1c0] sm:$0xff] }
 0x28e   : > { %v842_v62 = vpop.permute.xlu1 %841 }
 0x28f   : > { %v907_v53 = vrot.slane %v842_v62, %v2634_v50  ;;  %v899_v62 = vsel %vm618_vm7, %v898_v44, %v894_v55  ;;  %v1277_v55 = vld [vmem:[#allocation10 + $0x1c8] sm:$0xff] }
 0x290   : > { %1286 = vmatprep.subr.mxu0 %v1277_v55  ;;  %v1248_v55 = vld [vmem:[#allocation10 + $0xe0] sm:$0xff] }
 0x291   : > { %v908_v36 = vsel %vm618_vm7, %v907_v53, %v903_v25  ;;  %v1272_v25 = vld [vmem:[#allocation10 + $0x1a0] sm:$0xff]  ;;  %1287 = vmatpush1.msra.mxu0 %v1276_v47  ;;  %v1263_v47 = vld [vmem:[#allocation10 + $0x158] sm:$0xff] }
 0x292   : > { %v848_v28 = vpop.permute.xlu1 %847 }
 0x293   : > { %v916_v56 = vrot.slane %v848_v28, %v2634_v50  ;;  %v930_v28 = vsel %vm689_vm11, %v899_v62, %v929_v24  ;;  %v1282_v62 = vld [vmem:[#allocation10 + $0x1f0] sm:$0xff]  ;;  %v1260_v24 = vld [vmem:[#allocation10 + $0x140] sm:$0xff] }
 0x294   : > { %v931_v35 = vsel %vm691_vm12, %v908_v36, %v930_v28  ;;  %v1279_v36 = vld [vmem:[#allocation10 + $0x1d8] sm:$0xff]  ;;  %1356 = vmatpush1.msra.mxu1 %v1282_v62  ;;  %v1274_v28 = vld [vmem:[#allocation10 + $0x1b0] sm:$0xff] }
 0x295   : > { %v917_v17 = vsel %vm618_vm7, %v916_v56, %v912_v42  ;;  %v1268_v56 = vld [vmem:[#allocation10 + $0x180] sm:$0xff]  ;;  %v1265_v42 = vld [vmem:[#allocation10 + $0x168] sm:$0xff]  ;;  %1357 = vmatprep.subr.mxu1 %v1279_v36  ;;  %v1255_v62 = vld [vmem:[#allocation10 + $0x118] sm:$0xff] }
 0x296   : > { %v854_v40 = vpop.permute.xlu1 %853  ;;  %v932_v44 = vsel %vm693_vm13, %v917_v17, %v931_v35  ;;  %v1278_v17 = vld [vmem:[#allocation10 + $0x1d0] sm:$0xff]  ;;  %v1271_v35 = vld [vmem:[#allocation10 + $0x198] sm:$0xff] }
 0x297   : > { %v925_v60 = vrot.slane %v854_v40, %v2634_v50  ;;  %v1273_v50 = vld [vmem:[#allocation10 + $0x1a8] sm:$0xff]  ;;  %v1275_v40 = vld [vmem:[#allocation10 + $0x1b8] sm:$0xff]  ;;  %1358 = vmatpush1.msra.mxu1 %v1278_v17  ;;  %v1254_v36 = vld [vmem:[#allocation10 + $0x110] sm:$0xff] }
 0x298   : > { %1288 = vmatprep.subr.mxu0 %v1273_v50  ;;  %1359 = vmatprep.subr.mxu1 %v1275_v40  ;;  %v1245_v50 = vld [vmem:[#allocation10 + $0xc8] sm:$0xff]  ;;  %v1251_v17 = vld [vmem:[#allocation10 + $0xf8] sm:$0xff] }
 0x299   : > { %v926_v45 = vsel %vm618_vm7, %v925_v60, %v921_v18  ;;  %1289 = vmatpush1.msra.mxu0 %v1272_v25  ;;  %v1257_v18 = vld [vmem:[#allocation10 + $0x128] sm:$0xff]  ;;  %v1256_v60 = vld [vmem:[#allocation10 + $0x120] sm:$0xff]  ;;  %1360 = vmatpush1.msra.mxu1 %v1274_v28  ;;  %v1262_v25 = vld [vmem:[#allocation10 + $0x150] sm:$0xff] }
 0x29a   : > { %v933_v21 = vsel %vm695_vm14, %v926_v45, %v932_v44  ;;  %1290 = vmatprep.subr.mxu0 %v1269_v63  ;;  %v1253_v45 = vld [vmem:[#allocation10 + $0x108] sm:$0xff]  ;;  %v1270_v44 = vld [vmem:[#allocation10 + $0x190] sm:$0xff]  ;;  %1361 = vmatprep.subr.mxu1 %v1271_v35  ;;  %v1244_v63 = vld [vmem:[#allocation10 + $0xc0] sm:$0xff] }
 0x29b   : > { %v935_v53 = vsel %vm698_vm15, %v933_v21, 0.0  ;;  %1291 = vmatpush1.msra.mxu0 %v1268_v56  ;;  %v1252_v21 = vld [vmem:[#allocation10 + $0x100] sm:$0xff]  ;;  %1362 = vmatpush1.msra.mxu1 %v1270_v44  ;;  %v1259_v56 = vld [vmem:[#allocation10 + $0x138] sm:$0xff]  ;;  %v1233_v40 = vld [vmem:[#allocation10 + $0x68] sm:$0xff] }
 0x29c   : > { %936 = vadd.xlane.f32.xlu0 %v935_v53  ;;  %1292 = vmatprep.subr.mxu0 %v1265_v42  ;;  %v1267_v53 = vld [vmem:[#allocation10 + $0x178] sm:$0xff]  ;;  %v1241_v42 = vld [vmem:[#allocation10 + $0xa8] sm:$0xff]  ;;  %v1232_v28 = vld [vmem:[#allocation10 + $0x60] sm:$0xff] }
 0x29d   : > { %1293 = vmatpush1.msra.mxu0 %v1264_v32  ;;  %1363 = vmatprep.subr.mxu1 %v1267_v53  ;;  %v1258_v32 = vld [vmem:[#allocation10 + $0x130] sm:$0xff]  ;;  %v1229_v35 = vld [vmem:[#allocation10 + $0x48] sm:$0xff]  ;;  %v1228_v44 = vld [vmem:[#allocation10 + $0x40] sm:$0xff] }
 0x29e   : > { %1294 = vmatprep.subr.mxu0 %v1261_v27  ;;  %1364 = vmatpush1.msra.mxu1 %v1266_v30  ;;  %v1237_v27 = vld [vmem:[#allocation10 + $0x88] sm:$0xff]  ;;  %v1224_v30 = vld [vmem:[#allocation10 + $0x20] sm:$0xff] }
 0x29f   : > { %1295 = vmatpush1.msra.mxu0 %v1260_v24  ;;  %1365 = vmatprep.subr.mxu1 %v1263_v47  ;;  %v1236_v24 = vld [vmem:[#allocation10 + $0x80] sm:$0xff]  ;;  %v1225_v53 = vld [vmem:[#allocation10 + $0x28] sm:$0xff] }
 0x2a0   : > { %1296 = vmatprep.subr.mxu0 %v1257_v18  ;;  %1366 = vmatpush1.msra.mxu1 %v1262_v25  ;;  %v1250_v18 = vld [vmem:[#allocation10 + $0xf0] sm:$0xff]  ;;  %v1221_v47 = vld [vmem:[#allocation10 + $0x8] sm:$0xff]  ;;  %v1220_v25 = vld [vmem:[#allocation10] sm:$0xff] }
 0x2a1   : > { %1297 = vmatpush1.msra.mxu0 %v1256_v60  ;;  %1367 = vmatprep.subr.mxu1 %v1259_v56  ;;  %v1247_v60 = vld [vmem:[#allocation10 + $0xd8] sm:$0xff]  ;;  %v1217_v56 = vld [vmem:[#allocation9 + $0x1e8] sm:$0xff] }
 0x2a2   : > { %1298 = vmatprep.subr.mxu0 %v1253_v45  ;;  %1368 = vmatpush1.msra.mxu1 %v1258_v32  ;;  %v1246_v45 = vld [vmem:[#allocation10 + $0xd0] sm:$0xff] }
 0x2a3   : > { %1299 = vmatpush1.msra.mxu0 %v1252_v21  ;;  %1369 = vmatprep.subr.mxu1 %v1255_v62  ;;  %v1243_v21 = vld [vmem:[#allocation10 + $0xb8] sm:$0xff]  ;;  %v1234_v32 = vld [vmem:[#allocation10 + $0x70] sm:$0xff] }
 0x2a4   : > { %1300 = vmatprep.subr.mxu0 %v1249_v26  ;;  %1370 = vmatpush1.msra.mxu1 %v1254_v36  ;;  %v1242_v26 = vld [vmem:[#allocation10 + $0xb0] sm:$0xff]  ;;  %v1231_v62 = vld [vmem:[#allocation10 + $0x58] sm:$0xff] }
 0x2a5   : > { %1301 = vmatpush1.msra.mxu0 %v1248_v55  ;;  %1371 = vmatprep.subr.mxu1 %v1251_v17  ;;  %v1239_v55 = vld [vmem:[#allocation10 + $0x98] sm:$0xff]  ;;  %v1230_v36 = vld [vmem:[#allocation10 + $0x50] sm:$0xff] }
 0x2a6   : > { %1302 = vmatprep.subr.mxu0 %v1245_v50  ;;  %1372 = vmatpush1.msra.mxu1 %v1250_v18  ;;  %v1238_v50 = vld [vmem:[#allocation10 + $0x90] sm:$0xff]  ;;  %v1227_v17 = vld [vmem:[#allocation10 + $0x38] sm:$0xff] }
 0x2a7   : > { %1303 = vmatpush1.msra.mxu0 %v1244_v63  ;;  %1373 = vmatprep.subr.mxu1 %v1247_v60  ;;  %v1235_v63 = vld [vmem:[#allocation10 + $0x78] sm:$0xff]  ;;  %v1226_v18 = vld [vmem:[#allocation10 + $0x30] sm:$0xff] }
 0x2a8   : > { %1304 = vmatprep.subr.mxu0 %v1241_v42  ;;  %1374 = vmatpush1.msra.mxu1 %v1246_v45  ;;  %v1216_v42 = vld [vmem:[#allocation9 + $0x1e0] sm:$0xff]  ;;  %v1223_v60 = vld [vmem:[#allocation10 + $0x18] sm:$0xff]  ;;  %v1222_v45 = vld [vmem:[#allocation10 + $0x10] sm:$0xff] }
 0x2a9   : > { %1305 = vmatpush1.msra.mxu0 %v1240_v38  ;;  %1375 = vmatprep.subr.mxu1 %v1243_v21  ;;  %v1213_v38 = vld [vmem:[#allocation9 + $0x1c8] sm:$0xff]  ;;  %v1219_v21 = vld [vmem:[#allocation9 + $0x1f8] sm:$0xff] }
 0x2aa   : > { %1306 = vmatprep.subr.mxu0 %v1237_v27  ;;  %1376 = vmatpush1.msra.mxu1 %v1242_v26  ;;  %v1212_v27 = vld [vmem:[#allocation9 + $0x1c0] sm:$0xff]  ;;  %v1197_v26 = vld [vmem:[#allocation9 + $0x148] sm:$0xff] }
 0x2ab   : > { %1307 = vmatpush1.msra.mxu0 %v1236_v24  ;;  %1377 = vmatprep.subr.mxu1 %v1239_v55  ;;  %v1209_v24 = vld [vmem:[#allocation9 + $0x1a8] sm:$0xff]  ;;  %v1196_v55 = vld [vmem:[#allocation9 + $0x140] sm:$0xff] }
 0x2ac   : > { %1308 = vmatprep.subr.mxu0 %v1233_v40  ;;  %1378 = vmatpush1.msra.mxu1 %v1238_v50  ;;  %v1208_v40 = vld [vmem:[#allocation9 + $0x1a0] sm:$0xff]  ;;  %v1193_v50 = vld [vmem:[#allocation9 + $0x128] sm:$0xff] }
 0x2ad   : > { %1309 = vmatpush1.msra.mxu0 %v1232_v28  ;;  %1379 = vmatprep.subr.mxu1 %v1235_v63  ;;  %v1205_v28 = vld [vmem:[#allocation9 + $0x188] sm:$0xff]  ;;  %v1192_v63 = vld [vmem:[#allocation9 + $0x120] sm:$0xff] }
 0x2ae   : > { %1310 = vmatprep.subr.mxu0 %v1229_v35  ;;  %1380 = vmatpush1.msra.mxu1 %v1234_v32  ;;  %v1204_v35 = vld [vmem:[#allocation9 + $0x180] sm:$0xff]  ;;  %v1210_v32 = vld [vmem:[#allocation9 + $0x1b0] sm:$0xff] }
 0x2af   : > { %1311 = vmatpush1.msra.mxu0 %v1228_v44  ;;  %1381 = vmatprep.subr.mxu1 %v1231_v62  ;;  %v1201_v44 = vld [vmem:[#allocation9 + $0x168] sm:$0xff]  ;;  %v1207_v62 = vld [vmem:[#allocation9 + $0x198] sm:$0xff] }
 0x2b0   : > { %1312 = vmatprep.subr.mxu0 %v1225_v53  ;;  %1382 = vmatpush1.msra.mxu1 %v1230_v36  ;;  %v1200_v53 = vld [vmem:[#allocation9 + $0x160] sm:$0xff]  ;;  %v1206_v36 = vld [vmem:[#allocation9 + $0x190] sm:$0xff] }
 0x2b1   : > { %1313 = vmatpush1.msra.mxu0 %v1224_v30  ;;  %1383 = vmatprep.subr.mxu1 %v1227_v17  ;;  %v1218_v30 = vld [vmem:[#allocation9 + $0x1f0] sm:$0xff]  ;;  %v1180_v17 = vld [vmem:[#allocation9 + $0xc0] sm:$0xff] }
 0x2b2   : > { %1314 = vmatprep.subr.mxu0 %v1221_v47  ;;  %1384 = vmatpush1.msra.mxu1 %v1226_v18  ;;  %v1215_v47 = vld [vmem:[#allocation9 + $0x1d8] sm:$0xff]  ;;  %v1176_v18 = vld [vmem:[#allocation9 + $0xa0] sm:$0xff] }
 0x2b3   : > { %1315 = vmatpush1.msra.mxu0 %v1220_v25  ;;  %1385 = vmatprep.subr.mxu1 %v1223_v60  ;;  %v1214_v25 = vld [vmem:[#allocation9 + $0x1d0] sm:$0xff]  ;;  %v1172_v60 = vld [vmem:[#allocation9 + $0x80] sm:$0xff] }
 0x2b4   : > { %1426 = vmatprep.subr.mxu0 %v1217_v56  ;;  %1349 = vmatmul.mubr.f32.vlgmr.msra.gmra.mxu0 %v2623_v39  ;;  %v1211_v56 = vld [vmem:[#allocation9 + $0x1b8] sm:$0xff] }
 0x2b5   : > { %1427 = vmatpush1.msra.mxu0 %v1216_v42  ;;  %1386 = vmatpush1.msra.mxu1 %v1222_v45  ;;  %v1189_v42 = vld [vmem:[#allocation9 + $0x108] sm:$0xff]  ;;  %v1168_v45 = vld [vmem:[#allocation9 + $0x60] sm:$0xff] }
 0x2b6   : > { %1428 = vmatprep.subr.mxu0 %v1213_v38  ;;  %1497 = vmatprep.subr.mxu1 %v1219_v21  ;;  %v1188_v38 = vld [vmem:[#allocation9 + $0x100] sm:$0xff]  ;;  %v1165_v21 = vld [vmem:[#allocation9 + $0x48] sm:$0xff] }
 0x2b7   : > { %1429 = vmatpush1.msra.mxu0 %v1212_v27  ;;  %1420 = vmatmul.mubr.f32.vlgmr.msra.gmra.mxu1 %v2623_v39  ;;  %v1185_v27 = vld [vmem:[#allocation9 + $0xe8] sm:$0xff] }
 0x2b8   : > { %1430 = vmatprep.subr.mxu0 %v1209_v24  ;;  %1498 = vmatpush1.msra.mxu1 %v1218_v30  ;;  %v1184_v24 = vld [vmem:[#allocation9 + $0xe0] sm:$0xff]  ;;  %v1181_v39 = vld [vmem:[#allocation9 + $0xc8] sm:$0xff] }
 0x2b9   : > { %1431 = vmatpush1.msra.mxu0 %v1208_v40  ;;  %1499 = vmatprep.subr.mxu1 %v1215_v47  ;;  %v1177_v40 = vld [vmem:[#allocation9 + $0xa8] sm:$0xff] }
 0x2ba   : > { %1432 = vmatprep.subr.mxu0 %v1205_v28  ;;  %1500 = vmatpush1.msra.mxu1 %v1214_v25  ;;  %v1173_v28 = vld [vmem:[#allocation9 + $0x88] sm:$0xff] }
 0x2bb   : > { %1433 = vmatpush1.msra.mxu0 %v1204_v35  ;;  %1501 = vmatprep.subr.mxu1 %v1211_v56  ;;  %v1169_v35 = vld [vmem:[#allocation9 + $0x68] sm:$0xff] }
 0x2bc   : > { %1434 = vmatprep.subr.mxu0 %v1201_v44  ;;  %1502 = vmatpush1.msra.mxu1 %v1210_v32  ;;  %v1203_v32 = vld [vmem:[#allocation9 + $0x178] sm:$0xff] }
 0x2bd   : > { %1435 = vmatpush1.msra.mxu0 %v1200_v53  ;;  %1503 = vmatprep.subr.mxu1 %v1207_v62  ;;  %v3023_v53 = vsub.s32 4, %v2625_v43 }
 0x2be   : > { %1436 = vmatprep.subr.mxu0 %v1197_v26  ;;  %1504 = vmatpush1.msra.mxu1 %v1206_v36  ;;  %v1202_v36 = vld [vmem:[#allocation9 + $0x170] sm:$0xff] }
 0x2bf   : > { %1437 = vmatpush1.msra.mxu0 %v1196_v55  ;;  %1490 = vmatprep.mubr.f32.mxu0 %v2368_v23  ;;  %v3024_v55 = vsub.s32 7, %v2625_v43 }
 0x2c0   : > { %1438 = vmatprep.subr.mxu0 %v1193_v50  ;;  %1561 = vmatprep.mubr.f32.mxu1 %v2368_v23  ;;  %v1164_v50 = vld [vmem:[#allocation9 + $0x40] sm:$0xff] }
 0x2c1   : > { %1439 = vmatpush1.msra.mxu0 %v1192_v63  ;;  %1505 = vmatprep.subr.mxu1 %v1203_v32 }
 0x2c2   : > { %1440 = vmatprep.subr.mxu0 %v1189_v42  ;;  %v1161_v42 = vld [vmem:[#allocation9 + $0x28] sm:$0xff]  ;;  %1506 = vmatpush1.msra.mxu1 %v1202_v36 }
 0x2c3   : > { %1441 = vmatpush1.msra.mxu0 %v1188_v38  ;;  %v1160_v38 = vld [vmem:[#allocation9 + $0x20] sm:$0xff] }
 0x2c4   : > { %1442 = vmatprep.subr.mxu0 %v1185_v27 }
 0x2c5   : > { %1443 = vmatpush1.msra.mxu0 %v1184_v24  ;;  %v1157_v24 = vld [vmem:[#allocation9 + $0x8] sm:$0xff] }
 0x2c6   : > { %1444 = vmatprep.subr.mxu0 %v1181_v39  ;;  %v1199_v39 = vld [vmem:[#allocation9 + $0x158] sm:$0xff] }
 0x2c7   : > { %1445 = vmatpush1.msra.mxu0 %v1180_v17  ;;  %1507 = vmatprep.subr.mxu1 %v1199_v39  ;;  %v1175_v39 = vld [vmem:[#allocation9 + $0x98] sm:$0xff] }
 0x2c8   : > { %1446 = vmatprep.subr.mxu0 %v1177_v40 }
 0x2c9   : > { %1447 = vmatpush1.msra.mxu0 %v1176_v18  ;;  %v1156_v18 = vld [vmem:[#allocation9] sm:$0xff] }
 0x2ca   : > { %1448 = vmatprep.subr.mxu0 %v1173_v28  ;;  %v1198_v28 = vld [vmem:[#allocation9 + $0x150] sm:$0xff] }
 0x2cb   : > { %1449 = vmatpush1.msra.mxu0 %v1172_v60  ;;  %1508 = vmatpush1.msra.mxu1 %v1198_v28  ;;  %v1167_v28 = vld [vmem:[#allocation9 + $0x58] sm:$0xff] }
 0x2cc   : > { %1450 = vmatprep.subr.mxu0 %v1169_v35 }
 0x2cd   : > { %1451 = vmatpush1.msra.mxu0 %v1168_v45 }
 0x2ce   : > { %1452 = vmatprep.subr.mxu0 %v1165_v21 }
 0x2cf   : > { %1453 = vmatpush1.msra.mxu0 %v1164_v50  ;;  %v1191_v50 = vld [vmem:[#allocation9 + $0x118] sm:$0xff] }
 0x2d0   : > { %1454 = vmatprep.subr.mxu0 %v1161_v42  ;;  %v1182_v42 = vld [vmem:[#allocation9 + $0xd0] sm:$0xff] }
 0x2d1   : > { %1455 = vmatpush1.msra.mxu0 %v1160_v38  ;;  %v1179_v38 = vld [vmem:[#allocation9 + $0xb8] sm:$0xff] }
 0x2d2   : > { %1456 = vmatprep.subr.mxu0 %v1157_v24  ;;  %v1178_v24 = vld [vmem:[#allocation9 + $0xb0] sm:$0xff] }
 0x2d3   : > { %1457 = vmatpush1.msra.mxu0 %v1156_v18  ;;  %v1170_v18 = vld [vmem:[#allocation9 + $0x70] sm:$0xff] }
 0x325   : > { %v2871_v44 = vpop.xlane.xlu0 %936 }
 0x326   : > { %v958_v26 = vrot.slane %v2871_v44, %v3023_v53  ;;  %v942_v30 = vrot.slane %v2871_v44, %v2638_v52  ;;  %v970_v47 = vrot.slane %v2871_v44, %v3024_v55  ;;  %v946_v25 = vrot.slane %v2871_v44, %v2742_v31 }
 0x327   : > { %v950_v63 = vrot.slane %v2871_v44, %v2750_v41 }
 0x328   : > { %2119 = vrcp.f32 %v958_v26  ;;  %v1155_v26 = vld [vmem:[%s2557_s26] sm:$0xff] }
 0x329   : > { %2121 = vrcp.f32 %v942_v30  ;;  %1491 = vmatmul.mubr.f32.vlgmr.msra.gmra.mxu0 %v1155_v26 }
 0x32a   : > { %2123 = vrcp.f32 %v970_v47  ;;  %v1194_v47 = vld [vmem:[#allocation9 + $0x130] sm:$0xff]  ;;  %1712 = vmatprep.mubr.f32.mxu0 %v2368_v23 }
 0x32b   : > { %2125 = vrcp.f32 %v946_v25  ;;  %v1190_v25 = vld [vmem:[#allocation9 + $0x110] sm:$0xff] }
 0x32c   : > { %2127 = vrcp.f32 %v950_v63  ;;  %v1183_v63 = vld [vmem:[#allocation9 + $0xd8] sm:$0xff] }
 0x335   : > { %v2885_v56 = vpop.eup %2119 }
 0x336   : > { %v2122_v62 = vpop.eup %2121  ;;  %v992_v27 = vmul.f32 %v2885_v56, %v2818_v22 }
 0x337   : > { %v2889_v17 = vpop.eup %2123  ;;  %v980_v40 = vmul.f32 %v2122_v62, %v2776_v33  ;;  %v981_v60 = vmul.f32 %v2122_v62, %v2778_v34  ;;  %v954_v33 = vrot.slane %v2871_v44, %v2766_v16  ;;  %v3025_v34 = vsub.s32 5, %v2625_v43 }
 0x338   : > { %1045 = vperm.xlu0 %2085, %v992_v27   ;;  %v1001_v22 = vmul.f32 %v2889_v17, %v2807_v29  ;;  %v2126_v35 = vpop.eup %2125  ;;  %v1195_v29 = vld [vmem:[#allocation9 + $0x138] sm:$0xff]  ;;  %v3026_v27 = vsub.s32 6, %v2625_v43 }
 0x339   : > { %1005 = vperm.xlu1 %2084, %v980_v40   ;;  %v983_v45 = vmul.f32 %v2126_v35, %v2785_v61  ;;  %2129 = vrcp.f32 %v954_v33  ;;  %v984_v21 = vmul.f32 %v2126_v35, %v2789_v46  ;;  %v2128_v53 = vpop.eup %2127  ;;  %v962_v55 = vrot.slane %v2871_v44, %v3025_v34  ;;  %1509 = vmatprep.subr.mxu1 %v1195_v29  ;;  %v1187_v61 = vld [vmem:[#allocation9 + $0xf8] sm:$0xff]  ;;  %v1186_v46 = vld [vmem:[#allocation9 + $0xf0] sm:$0xff] }
 0x33a   : > { %v986_v30 = vmul.f32 %v2128_v53, %v2796_v49  ;;  %1510 = vmatpush1.msra.mxu1 %v1194_v47  ;;  %v987_v49 = vmul.f32 %v2128_v53, %v2804_v57  ;;  %v966_v36 = vrot.slane %v2871_v44, %v3026_v27  ;;  %v1174_v57 = vld [vmem:[#allocation9 + $0x90] sm:$0xff]  ;;  %v1171_v40 = vld [vmem:[#allocation9 + $0x78] sm:$0xff]  ;;  %v993_v44 = vmul.f32 %v2885_v56, %v2821_v37  ;;  %v1629_v56 = vld [vmem:[#allocation12 + $0x1e8] sm:$0xff] }
 0x33b   : > { %1511 = vmatprep.subr.mxu1 %v1191_v50  ;;  %2131 = vrcp.f32 %v962_v55  ;;  %v1163_v43 = vld [vmem:[#allocation9 + $0x38] sm:$0xff]  ;;  %1648 = vmatprep.subr.mxu0 %v1629_v56  ;;  %v1630_v34 = vld [vmem:[#allocation12 + $0x1f0] sm:$0xff]  ;;  %v1625_v55 = vld [vmem:[#allocation12 + $0x1c8] sm:$0xff] }
 0x33c   : > { %1075 = vperm.xlu0 %2085, %v1001_v22   ;;  %1512 = vmatpush1.msra.mxu1 %v1190_v25  ;;  %2133 = vrcp.f32 %v966_v36  ;;  %v1159_v35 = vld [vmem:[#allocation9 + $0x18] sm:$0xff]  ;;  %v1620_v25 = vld [vmem:[#allocation12 + $0x1a0] sm:$0xff]  ;;  %v1610_v36 = vld [vmem:[#allocation12 + $0x150] sm:$0xff] }
 0x33d   : > { %1010 = vperm.xlu1 %2084, %v981_v60   ;;  %1513 = vmatprep.subr.mxu1 %v1187_v61  ;;  %v1162_v60 = vld [vmem:[#allocation9 + $0x30] sm:$0xff]  ;;  %v1631_v29 = vld [vmem:[#allocation12 + $0x1f8] sm:$0xff]  ;;  %v1608_v27 = vld [vmem:[#allocation12 + $0x140] sm:$0xff] }
 0x33e   : > { %1514 = vmatpush1.msra.mxu1 %v1186_v46  ;;  %v1627_v47 = vld [vmem:[#allocation12 + $0x1d8] sm:$0xff]  ;;  %v1622_v61 = vld [vmem:[#allocation12 + $0x1b0] sm:$0xff]  ;;  %v1617_v46 = vld [vmem:[#allocation12 + $0x188] sm:$0xff] }
 0x33f   : > { %1515 = vmatprep.subr.mxu1 %v1183_v63  ;;  %v1623_v50 = vld [vmem:[#allocation12 + $0x1b8] sm:$0xff]  ;;  %v1588_v56 = vld [vmem:[#allocation12 + $0xa0] sm:$0xff] }
 0x340   : > { %1516 = vmatpush1.msra.mxu1 %v1182_v42  ;;  %v1619_v63 = vld [vmem:[#allocation12 + $0x198] sm:$0xff]  ;;  %v1613_v42 = vld [vmem:[#allocation12 + $0x168] sm:$0xff] }
 0x341   : > { %1015 = vperm.xlu1 %2084, %v983_v45   ;;  %1517 = vmatprep.subr.mxu1 %v1179_v38  ;;  %v1158_v45 = vld [vmem:[#allocation9 + $0x10] sm:$0xff]  ;;  %v1612_v38 = vld [vmem:[#allocation12 + $0x160] sm:$0xff] }
 0x342   : > { %1518 = vmatpush1.msra.mxu1 %v1178_v24  ;;  %v1605_v24 = vld [vmem:[#allocation12 + $0x128] sm:$0xff] }
 0x343   : > { %1519 = vmatprep.subr.mxu1 %v1175_v39  ;;  %v1607_v39 = vld [vmem:[#allocation12 + $0x138] sm:$0xff] }
 0x344   : > { %1520 = vmatpush1.msra.mxu1 %v1174_v57  ;;  %v1604_v57 = vld [vmem:[#allocation12 + $0x120] sm:$0xff] }
 0x345   : > { %1020 = vperm.xlu1 %2084, %v984_v21   ;;  %1521 = vmatprep.subr.mxu1 %v1171_v40  ;;  %v1606_v40 = vld [vmem:[#allocation12 + $0x130] sm:$0xff] }
 0x346   : > { %v2130_v32 = vpop.eup %2129  ;;  %1522 = vmatpush1.msra.mxu1 %v1170_v18  ;;  %v1601_v18 = vld [vmem:[#allocation12 + $0x108] sm:$0xff] }
 0x347   : > { %v989_v62 = vmul.f32 %v2130_v32, %v2811_v19  ;;  %v990_v22 = vmul.f32 %v2130_v32, %v2815_v20  ;;  %v1166_v19 = vld [vmem:[#allocation9 + $0x50] sm:$0xff]  ;;  %1523 = vmatprep.subr.mxu1 %v1167_v28  ;;  %v1615_v32 = vld [vmem:[#allocation12 + $0x178] sm:$0xff] }
 0x348   : > { %1524 = vmatpush1.msra.mxu1 %v1166_v19  ;;  %v2132_v33 = vpop.eup %2131  ;;  %v1603_v28 = vld [vmem:[#allocation12 + $0x118] sm:$0xff]  ;;  %v1602_v19 = vld [vmem:[#allocation12 + $0x110] sm:$0xff] }
 0x349   : > { %1025 = vperm.xlu1 %2084, %v986_v30   ;;  %1525 = vmatprep.subr.mxu1 %v1163_v43  ;;  %v995_v20 = vmul.f32 %v2132_v33, %v2792_v48  ;;  %v996_v21 = vmul.f32 %v2132_v33, %v2824_v59  ;;  %v2134_v53 = vpop.eup %2133  ;;  %v1628_v30 = vld [vmem:[#allocation12 + $0x1e0] sm:$0xff]  ;;  %v1597_v43 = vld [vmem:[#allocation12 + $0xe8] sm:$0xff]  ;;  %v1598_v33 = vld [vmem:[#allocation12 + $0xf0] sm:$0xff] }
 0x34a   : > { %1526 = vmatpush1.msra.mxu1 %v1162_v60  ;;  %v998_v37 = vmul.f32 %v2134_v53, %v2799_v51  ;;  %1649 = vmatpush1.msra.mxu0 %v1628_v30  ;;  %v999_v48 = vmul.f32 %v2134_v53, %v2827_v58  ;;  %v1624_v59 = vld [vmem:[#allocation12 + $0x1c0] sm:$0xff]  ;;  %v1002_v51 = vmul.f32 %v2889_v17, %v2830_v54  ;;  %v1614_v54 = vld [vmem:[#allocation12 + $0x170] sm:$0xff]  ;;  %v1609_v17 = vld [vmem:[#allocation12 + $0x148] sm:$0xff] }
 0x34b   : > { %1527 = vmatprep.subr.mxu1 %v1159_v35  ;;  %1650 = vmatprep.subr.mxu0 %v1625_v55  ;;  %v1616_v58 = vld [vmem:[#allocation12 + $0x180] sm:$0xff]  ;;  %v1593_v35 = vld [vmem:[#allocation12 + $0xc8] sm:$0xff] }
 0x34c   : > { %1528 = vmatpush1.msra.mxu1 %v1158_v45  ;;  %1651 = vmatpush1.msra.mxu0 %v1624_v59  ;;  %v1596_v60 = vld [vmem:[#allocation12 + $0xe0] sm:$0xff]  ;;  %v1595_v45 = vld [vmem:[#allocation12 + $0xd8] sm:$0xff]  ;;  %v1589_v53 = vld [vmem:[#allocation12 + $0xa8] sm:$0xff] }
 0x34d   : > { %1030 = vperm.xlu1 %2084, %v987_v49   ;;  %1562 = vmatmul.mubr.f32.vlgmr.msra.gmra.mxu1 %v1155_v26  ;;  %v1621_v26 = vld [vmem:[#allocation12 + $0x1a8] sm:$0xff]  ;;  %v1618_v49 = vld [vmem:[#allocation12 + $0x190] sm:$0xff]  ;;  %v1584_v55 = vld [vmem:[#allocation12 + $0x80] sm:$0xff] }
 0x34e   : > { %1783 = vmatprep.mubr.f32.mxu1 %v2368_v23  ;;  %1719 = vmatprep.subr.mxu1 %v1631_v29  ;;  %v1626_v23 = vld [vmem:[#allocation12 + $0x1d0] sm:$0xff]  ;;  %v1585_v30 = vld [vmem:[#allocation12 + $0x88] sm:$0xff]  ;;  %v1583_v59 = vld [vmem:[#allocation12 + $0x78] sm:$0xff] }
 0x34f   : > { %1720 = vmatpush1.msra.mxu1 %v1630_v34  ;;  %1652 = vmatprep.subr.mxu0 %v1621_v26  ;;  %v1590_v29 = vld [vmem:[#allocation12 + $0xb0] sm:$0xff]  ;;  %v1587_v34 = vld [vmem:[#allocation12 + $0x98] sm:$0xff]  ;;  %v1577_v26 = vld [vmem:[#allocation12 + $0x48] sm:$0xff] }
 0x350   : > { %1721 = vmatprep.subr.mxu1 %v1627_v47  ;;  %1653 = vmatpush1.msra.mxu0 %v1620_v25  ;;  %v1586_v47 = vld [vmem:[#allocation12 + $0x90] sm:$0xff]  ;;  %v1576_v25 = vld [vmem:[#allocation12 + $0x40] sm:$0xff] }
 0x351   : > { %1035 = vperm.xlu1 %2084, %v989_v62   ;;  %1722 = vmatpush1.msra.mxu1 %v1626_v23  ;;  %v1611_v62 = vld [vmem:[#allocation12 + $0x158] sm:$0xff]  ;;  %v1580_v23 = vld [vmem:[#allocation12 + $0x60] sm:$0xff] }
 0x352   : > { %1723 = vmatprep.subr.mxu1 %v1623_v50  ;;  %1654 = vmatprep.subr.mxu0 %v1617_v46  ;;  %v1579_v50 = vld [vmem:[#allocation12 + $0x58] sm:$0xff]  ;;  %v1573_v46 = vld [vmem:[#allocation12 + $0x28] sm:$0xff] }
 0x353   : > { %1724 = vmatpush1.msra.mxu1 %v1622_v61  ;;  %1655 = vmatpush1.msra.mxu0 %v1616_v58  ;;  %v1578_v61 = vld [vmem:[#allocation12 + $0x50] sm:$0xff]  ;;  %v1572_v58 = vld [vmem:[#allocation12 + $0x20] sm:$0xff] }
 0x354   : > { %1725 = vmatprep.subr.mxu1 %v1619_v63  ;;  %1656 = vmatprep.subr.mxu0 %v1613_v42  ;;  %v1575_v63 = vld [vmem:[#allocation12 + $0x38] sm:$0xff]  ;;  %v1569_v42 = vld [vmem:[#allocation12 + $0x8] sm:$0xff] }
 0x355   : > { %1040 = vperm.xlu1 %2084, %v990_v22   ;;  %1726 = vmatpush1.msra.mxu1 %v1618_v49  ;;  %v1600_v22 = vld [vmem:[#allocation12 + $0x100] sm:$0xff]  ;;  %v1574_v49 = vld [vmem:[#allocation12 + $0x30] sm:$0xff] }
 0x356   : > { %1727 = vmatprep.subr.mxu1 %v1615_v32  ;;  %1657 = vmatpush1.msra.mxu0 %v1612_v38  ;;  %v1571_v32 = vld [vmem:[#allocation12 + $0x18] sm:$0xff]  ;;  %v1568_v38 = vld [vmem:[#allocation12] sm:$0xff] }
 0x357   : > { %1728 = vmatpush1.msra.mxu1 %v1614_v54  ;;  %1658 = vmatprep.subr.mxu0 %v1609_v17  ;;  %v1570_v54 = vld [vmem:[#allocation12 + $0x10] sm:$0xff] }
 0x358   : > { %1729 = vmatprep.subr.mxu1 %v1611_v62  ;;  %1659 = vmatpush1.msra.mxu0 %v1608_v27 }
 0x359   : > { %1050 = vperm.xlu1 %2084, %v993_v44   ;;  %1730 = vmatpush1.msra.mxu1 %v1610_v36  ;;  %v1599_v44 = vld [vmem:[#allocation12 + $0xf8] sm:$0xff] }
 0x35a   : > { %1660 = vmatprep.subr.mxu0 %v1605_v24  ;;  %1731 = vmatprep.subr.mxu1 %v1607_v39 }
 0x35b   : > { %1661 = vmatpush1.msra.mxu0 %v1604_v57  ;;  %1732 = vmatpush1.msra.mxu1 %v1606_v40 }
 0x35c   : > { %1662 = vmatprep.subr.mxu0 %v1601_v18  ;;  %1733 = vmatprep.subr.mxu1 %v1603_v28 }
 0x35d   : > { %1055 = vperm.xlu1 %2084, %v995_v20   ;;  %1663 = vmatpush1.msra.mxu0 %v1600_v22  ;;  %v1592_v20 = vld [vmem:[#allocation12 + $0xc0] sm:$0xff] }
 0x35e   : > { %1734 = vmatpush1.msra.mxu1 %v1602_v19  ;;  %1664 = vmatprep.subr.mxu0 %v1597_v43 }
 0x35f   : > { %1735 = vmatprep.subr.mxu1 %v1599_v44  ;;  %1665 = vmatpush1.msra.mxu0 %v1596_v60 }
 0x360   : > { %1736 = vmatpush1.msra.mxu1 %v1598_v33  ;;  %1666 = vmatprep.subr.mxu0 %v1593_v35 }
 0x361   : > { %1060 = vperm.xlu1 %2084, %v996_v21   ;;  %v1594_v21 = vld [vmem:[#allocation12 + $0xd0] sm:$0xff]  ;;  %1737 = vmatprep.subr.mxu1 %v1595_v45 }
 0x362   : > { %1667 = vmatpush1.msra.mxu0 %v1592_v20  ;;  %1738 = vmatpush1.msra.mxu1 %v1594_v21 }
 0x363   : > { %1668 = vmatprep.subr.mxu0 %v1589_v53 }
 0x364   : > { %1669 = vmatpush1.msra.mxu0 %v1588_v56 }
 0x365   : > { %1065 = vperm.xlu1 %2084, %v998_v37   ;;  %v1591_v37 = vld [vmem:[#allocation12 + $0xb8] sm:$0xff]  ;;  %1670 = vmatprep.subr.mxu0 %v1585_v30 }
 0x366   : > { %1739 = vmatprep.subr.mxu1 %v1591_v37  ;;  %1671 = vmatpush1.msra.mxu0 %v1584_v55 }
 0x367   : > { %1740 = vmatpush1.msra.mxu1 %v1590_v29 }
 0x368   : > { %1741 = vmatprep.subr.mxu1 %v1587_v34 }
 0x369   : > { %1070 = vperm.xlu1 %2084, %v999_v48   ;;  %v1581_v48 = vld [vmem:[#allocation12 + $0x68] sm:$0xff]  ;;  %1742 = vmatpush1.msra.mxu1 %v1586_v47 }
 0x36a   : > { %1672 = vmatprep.subr.mxu0 %v1581_v48  ;;  %1743 = vmatprep.subr.mxu1 %v1583_v59 }
 0x36b   : > { %1673 = vmatpush1.msra.mxu0 %v1580_v23 }
 0x36c   : > { %1674 = vmatprep.subr.mxu0 %v1577_v26 }
 0x36d   : > { %1080 = vperm.xlu1 %2084, %v1002_v51   ;;  %v1582_v51 = vld [vmem:[#allocation12 + $0x70] sm:$0xff]  ;;  %1675 = vmatpush1.msra.mxu0 %v1576_v25 }
 0x36e   : > { %1744 = vmatpush1.msra.mxu1 %v1582_v51  ;;  %1676 = vmatprep.subr.mxu0 %v1573_v46 }
 0x36f   : > { %1745 = vmatprep.subr.mxu1 %v1579_v50  ;;  %1677 = vmatpush1.msra.mxu0 %v1572_v58 }
 0x370   : > { %1746 = vmatpush1.msra.mxu1 %v1578_v61  ;;  %1678 = vmatprep.subr.mxu0 %v1569_v42 }
 0x371   : > { %1747 = vmatprep.subr.mxu1 %v1575_v63  ;;  %1679 = vmatpush1.msra.mxu0 %v1568_v38 }
 0x372   : > { %1748 = vmatpush1.msra.mxu1 %v1574_v49 }
 0x373   : > { %1749 = vmatprep.subr.mxu1 %v1571_v32 }
 0x374   : > { %1750 = vmatpush1.msra.mxu1 %v1570_v54 }
 0x3b3   : > { %v1046_v19 = vpop.permute.xlu0 %1045 }
 0x3b4   : > { %v1006_v17 = vpop.permute.xlu1 %1005 }
 0x3b5   : > { %v1083_v45 = vmul.f32 %v1006_v17, %v2571_v0 }
 0x3b7   : > { %v1076_v46 = vpop.permute.xlu0 %1075 }
 0x3b8   : > { %v1011_v62 = vpop.permute.xlu1 %1010  ;;  %v1097_v54 = vmul.f32 %v1076_v46, %v2599_v14 }
 0x3b9   : > { %v1084_v43 = vmul.f32 %v1011_v62, %v2573_v1 }
 0x3bb   : > { %v1099_v37 = vadd.f32 %v1084_v43, %v1083_v45 }
 0x3bc   : > { %v1016_v27 = vpop.permute.xlu1 %1015 }
 0x3bd   : > { %v1085_v44 = vmul.f32 %v1016_v27, %v2575_v2 }
 0x3c0   : > { %v1021_v36 = vpop.permute.xlu1 %1020 }
 0x3c1   : > { %v1086_v18 = vmul.f32 %v1021_v36, %v2577_v3  ;;  %v1091_v3 = vmul.f32 %v1046_v19, %v2587_v8 }
 0x3c3   : > { %v1106_v20 = vadd.f32 %v1086_v18, %v1085_v44 }
 0x3c4   : > { %v1026_v24 = vpop.permute.xlu1 %1025 }
 0x3c5   : > { %v1087_v33 = vmul.f32 %v1026_v24, %v2579_v4  ;;  %v1107_v29 = vrot.slane %v1106_v20, 4 }
 0x3c7   : > { %v1108_v55 = vadd.f32 %v1107_v29, %v1106_v20 }
 0x3c8   : > { %v1031_v39 = vpop.permute.xlu1 %1030 }
 0x3c9   : > { %v1088_v28 = vmul.f32 %v1031_v39, %v2581_v5  ;;  %v1109_v26 = vrot.slane %v1108_v55, 2 }
 0x3cb   : > { %v1113_v5 = vadd.f32 %v1088_v28, %v1087_v33  ;;  %v1110_v42 = vadd.f32 %v1109_v26, %v1108_v55 }
 0x3cc   : > { %v1036_v57 = vpop.permute.xlu1 %1035 }
 0x3cd   : > { %v1089_v21 = vmul.f32 %v1036_v57, %v2583_v6  ;;  %v1114_v2 = vrot.slane %v1113_v5, 4 }
 0x3cf   : > { %v1115_v6 = vadd.f32 %v1114_v2, %v1113_v5 }
 0x3d0   : > { %v1041_v40 = vpop.permute.xlu1 %1040 }
 0x3d1   : > { %v1090_v60 = vmul.f32 %v1041_v40, %v2585_v7  ;;  %v1100_v7 = vrot.slane %v1099_v37, 4  ;;  %v1116_v25 = vrot.slane %v1115_v6, 2  ;;  %v1111_v40 = vrot.slane %v1110_v42, 1 }
 0x3d3   : > { %v1120_v56 = vadd.f32 %v1090_v60, %v1089_v21  ;;  %v1101_v8 = vadd.f32 %v1100_v7, %v1099_v37  ;;  %v1117_v17 = vadd.f32 %v1116_v25, %v1115_v6  ;;  %v1112_v33 = vadd.f32 %v1111_v40, %v1110_v42 }
 0x3d4   : > { %v1051_v22 = vpop.permute.xlu1 %1050 }
 0x3d5   : > { %v1092_v35 = vmul.f32 %v1051_v22, %v2589_v9  ;;  %v1121_v34 = vrot.slane %v1120_v56, 4  ;;  %v1102_v63 = vrot.slane %v1101_v8, 2  ;;  %v1118_v22 = vrot.slane %v1117_v17, 1 }
 0x3d7   : > { %v1127_v1 = vadd.f32 %v1092_v35, %v1091_v3  ;;  %v1122_v59 = vadd.f32 %v1121_v34, %v1120_v56  ;;  %v1103_v27 = vadd.f32 %v1102_v63, %v1101_v8  ;;  %v1119_v20 = vadd.f32 %v1118_v22, %v1117_v17 }
 0x3d8   : > { %v1056_v53 = vpop.permute.xlu1 %1055 }
 0x3d9   : > { %v1093_v4 = vmul.f32 %v1056_v53, %v2591_v10  ;;  %v1128_v0 = vrot.slane %v1127_v1, 4  ;;  %v1123_v58 = vrot.slane %v1122_v59, 2 }
 0x3db   : > { %v1129_v51 = vadd.f32 %v1128_v0, %v1127_v1  ;;  %v1124_v36 = vadd.f32 %v1123_v58, %v1122_v59 }
 0x3dc   : > { %v1061_v30 = vpop.permute.xlu1 %1060 }
 0x3dd   : > { %v1094_v9 = vmul.f32 %v1061_v30, %v2593_v11  ;;  %v1130_v49 = vrot.slane %v1129_v51, 2  ;;  %v1125_v19 = vrot.slane %v1124_v36, 1 }
 0x3df   : > { %v1134_v47 = vadd.f32 %v1094_v9, %v1093_v4  ;;  %v1131_v57 = vadd.f32 %v1130_v49, %v1129_v51  ;;  %v1126_v3 = vadd.f32 %v1125_v19, %v1124_v36 }
 0x3e0   : > { %v1066_v48 = vpop.permute.xlu1 %1065 }
 0x3e1   : > { %v1135_v23 = vrot.slane %v1134_v47, 4  ;;  %v1095_v10 = vmul.f32 %v1066_v48, %v2595_v12  ;;  %v1132_v60 = vrot.slane %v1131_v57, 1  ;;  %v1421_v48 = vpop.f32.mrf.mxu1 }
 0x3e3   : > { %v1136_v50 = vadd.f32 %v1135_v23, %v1134_v47  ;;  %v1133_v53 = vadd.f32 %v1132_v60, %v1131_v57  ;;  %v1350_v47 = vpop.f32.mrf.mxu0  ;;  %v1423_v59 = vpop.f32.mrf.mxu1  ;;  %v1794_v23 = vld [vmem:[%s2997_s5] sm:$0xf] }
 0x3e4   : > { %v1071_v61 = vpop.permute.xlu1 %1070  ;;  %v1799_v25 = vrot.slane %v1794_v23, %v2638_v52  ;;  %v1803_v58 = vrot.slane %v1794_v23, %v2742_v31 }
 0x3e5   : > { %v1096_v11 = vmul.f32 %v1071_v61, %v2597_v13  ;;  %v1137_v32 = vrot.slane %v1136_v50, 2  ;;  %v1104_v13 = vrot.slane %v1103_v27, 1  ;;  %v1352_v6 = vpop.f32.mrf.mxu0 }
 0x3e7   : > { %v1141_v38 = vadd.f32 %v1096_v11, %v1095_v10  ;;  %v1138_v18 = vadd.f32 %v1137_v32, %v1136_v50  ;;  %v1105_v21 = vadd.f32 %v1104_v13, %v1103_v27 }
 0x3e8   : > { %v1081_v62 = vpop.permute.xlu1 %1080 }
 0x3e9   : > { %v1142_v24 = vrot.slane %v1141_v38, 4  ;;  %v1098_v39 = vmul.f32 %v1081_v62, %v2601_v15  ;;  %v1139_v14 = vrot.slane %v1138_v18, 1  ;;  %v1640_v37 = vsel %vm683_vm8, %v1112_v33, %v1105_v21  ;;  %v1492_v8 = vpop.f32.mrf.mxu0  ;;  %v436_v33 = vld [vmem:[#allocation3] sm:$0xff] }
 0x3ea   : > { %v1641_v29 = vsel %vm685_vm9, %v1119_v20, %v1640_v37  ;;  %v1493_v26 = vadd.f32 %v1492_v8, %v1350_v47 }
 0x3eb   : > { %v1143_v28 = vadd.f32 %v1142_v24, %v1141_v38  ;;  %v1148_v12 = vadd.f32 %v1098_v39, %v1097_v54  ;;  %v1140_v56 = vadd.f32 %v1139_v14, %v1138_v18  ;;  %v1642_v7 = vsel %vm687_vm10, %v1126_v3, %v1641_v29  ;;  %v1494_v51 = vpop.f32.mrf.mxu0 }
 0x3ec   : > { %v1643_v34 = vsel %vm689_vm11, %v1133_v53, %v1642_v7  ;;  %v1495_v46 = vadd.f32 %v1494_v51, %v1352_v6  ;;  %v1807_v24 = vrot.slane %v1794_v23, %v2750_v41 }
 0x3ed   : > { %v1144_v43 = vrot.slane %v1143_v28, 2  ;;  %v1149_v44 = vrot.slane %v1148_v12, 4  ;;  %v1644_v9 = vsel %vm691_vm12, %v1140_v56, %v1643_v34 }
 0x3ef   : > { %v1145_v35 = vadd.f32 %v1144_v43, %v1143_v28  ;;  %v1150_v45 = vadd.f32 %v1149_v44, %v1148_v12  ;;  %v1811_v28 = vrot.slane %v1794_v23, %v2766_v16 }
 0x3f1   : > { %v1146_v5 = vrot.slane %v1145_v35, 1  ;;  %v1151_v15 = vrot.slane %v1150_v45, 2 }
 0x3f3   : > { %v1152_v1 = vadd.f32 %v1151_v15, %v1150_v45  ;;  %v1147_v2 = vadd.f32 %v1146_v5, %v1145_v35 }
 0x3f5   : > { %v1153_v30 = vrot.slane %v1152_v1, 1  ;;  %v1645_v0 = vsel %vm693_vm13, %v1147_v2, %v1644_v9 }
 0x3f7   : > { %v1154_v4 = vadd.f32 %v1153_v30, %v1152_v1 }
 0x3f9   : > { %v1646_v55 = vsel %vm695_vm14, %v1154_v4, %v1645_v0 }
 0x3fa   : > { %1713 = vmatmul.mubr.f32.vlgmr.msra.gmra.mxu0 %v1646_v55  ;;  %1784 = vmatmul.mubr.f32.vlgmr.msra.gmra.mxu1 %v1646_v55 }
 0x40d   : > { %v1563_v50 = vpop.f32.mrf.mxu1 }
 0x40e   : > { %v1564_v17 = vadd.f32 %v1563_v50, %v1421_v48 }
 0x40f   : > { %v1565_v11 = vpop.f32.mrf.mxu1 }
 0x410   : > { %v1566_v40 = vadd.f32 %v1565_v11, %v1423_v59 }
 0x4ba   : > { %v1714_v61 = vpop.f32.mrf.mxu0  ;;  %v1785_v38 = vpop.f32.mrf.mxu1 }
 0x4bb   : > { %v1790_v63 = vadd.f32 %v1714_v61, %v1493_v26  ;;  %v1792_v36 = vadd.f32 %v1785_v38, %v1564_v17 }
 0x4bc   : > { %v1716_v10 = vpop.f32.mrf.mxu0  ;;  %v1787_v57 = vpop.f32.mrf.mxu1 }
 0x4bd   : > { %v1816_v49 = vadd.f32 %v1799_v25, %v1790_v63  ;;  %v1791_v42 = vadd.f32 %v1716_v10, %v1495_v46  ;;  %v1818_v39 = vadd.f32 %v1807_v24, %v1792_v36  ;;  %v1793_v18 = vadd.f32 %v1787_v57, %v1566_v40 }
 0x4bf   : > { %v1820_v32 = vsub.f32 0.0, %v1816_v49  ;;  %v1817_v54 = vadd.f32 %v1803_v58, %v1791_v42  ;;  %v1832_v31 = vsub.f32 0.0, %v1818_v39  ;;  %v1819_v13 = vadd.f32 %v1811_v28, %v1793_v18 }
 0x4c1   : > { %v1821_v62 = vmul.f32 1.442695, %v1820_v32  ;;  %v1826_v27 = vsub.f32 0.0, %v1817_v54  ;;  %v1833_v12 = vmul.f32 1.442695, %v1832_v31 }
 0x4c3   : > { %2135 = vpow2.f32 %v1821_v62  ;;  %v1827_v52 = vmul.f32 1.442695, %v1826_v27 }
 0x4c5   : > { %2137 = vpow2.f32 %v1827_v52 }
 0x4c6   : > { %2139 = vpow2.f32 %v1833_v12 }
 0x4d0   : > { %v2136_v22 = vpop.eup %2135 }
 0x4d1   : > { %v1823_v19 = vadd.f32 1.0, %v2136_v22 }
 0x4d2   : > { %v2138_v43 = vpop.eup %2137 }
 0x4d3   : > { %2141 = vrcp.f32 %v1823_v19  ;;  %v1829_v44 = vadd.f32 1.0, %v2138_v43  ;;  %v2140_v41 = vpop.eup %2139 }
 0x4d4   : > { %2143 = vtanh.f32 %v1819_v13  ;;  %v1835_v45 = vadd.f32 1.0, %v2140_v41 }
 0x4d5   : > { %2145 = vrcp.f32 %v1829_v44 }
 0x4d6   : > { %2147 = vrcp.f32 %v1835_v45 }
 0x4e0   : > { %v2142_v60 = vpop.eup %2141 }
 0x4e1   : > { %v2144_v14 = vpop.eup %2143 }
 0x4e2   : > { %v2146_v35 = vpop.eup %2145  ;;  %v1840_v20 = vmul.f32 %v2144_v14, %v2142_v60 }
 0x4e3   : > { %v1839_v16 = vmul.f32 %v2146_v35, %v436_v33  ;;  %v2148_v3 = vpop.eup %2147 }
 0x4e5   : > { %v1841_v21 = vadd.f32 %v1840_v20, %v1839_v16 }
 0x4e7   : > { %1845 = vst [vmem:[#allocation3] sm:$0xff] %v1841_v21  ;;  %2149 = vtanh.f32 %v1841_v21 }
 0x4f4   : > { %v2150_v5 = vpop.eup %2149 }
 0x4f5   : > { %v1843_v15 = vmul.f32 %v2150_v5, %v2148_v3 }
 0x4f7   : > { %1844 = vst [vmem:[#allocation2] sm:$0xff] %v1843_v15  ;;  %1846 = vst [vmem:[%s2603_s1] sm:$0xff] %v1843_v15 }
 0x4f8   : > { %2296 = shalt.err (!%p2293_p13)
}
 0x4f9   : > { %s2297_s13 = scalar_lea.hbm %s2955_s20, 128  ;;  %s2301_s26 = scalar_lea.hbm %s2998_s6, 1024 }
 0x4fa   : > { %p2298_p1 = scmp.ne.s32.totalorder %s2955_s20, %s2297_s13  ;;  %p2302_p6 = scmp.lt.s32.totalorder %s2955_s20, %s2998_s6 }
 0x4fb   : > { %p2303_p2 = scmp.lt.s32.totalorder %s2301_s26, %s2297_s13 }
 0x4fc   : > { %p2299_p3 = pnand %p2298_p1, %p3027_p10 }
 0x4fd   : > { %p2304_p8 = por %p2303_p2, %p2302_p6 }
 0x4fe   : > { %p2300_p4 = pneg %p2299_p3 }
 0x500   : > { %p2305_p7 = pnand %p2304_p8, %p2300_p4 }
 0x502   : > { %2308 = shalt.err (!%p2305_p7)
}
 0x503   : > { %2008 = dma.vmem_to_hbm [thread:$0]  (%p3027_p10), %s1862_s10, 128, %s2955_s20, %s1848_s30  }
 0x504 PF: > { %p2040_p0 = scmp.ge.s32.totalorder %s2355_s24, 2  ;;  %s1873_s16 = sand.u32 1, %s2343_s21  }
 0x505   : > { %p3028_p12 = scmp.ne.s32.totalorder %s3014_s19, 0  ;;  %s1874_s7 = scalar_lea.sflag [#allocation6], %s1873_s16 }
 0x507   : > { %p2028_p5 = pnand %p2040_p0, %p3028_p12 }
 0x509   : > { %p2029_p9 = pneg %p2028_p5 }
 0x50b   : > { %2338 = dma.done.wait (%p2029_p9), %s1874_s7, 128  }
 0x50c   : > { %2340 = vsyncadd (%p2029_p9), %s1874_s7, 4294967168  ;;  %p21_p11 = scmp.ge.s32.totalorder %s2490_s29, 10   ;;  %s3029_s21 = smov %s2347_s22 }
 0x50d   : > { %s3030_s22 = smov %s2351_s23  ;;  %s3031_s23 = smov %s2501_s14 }
 0x50e   : > { %s3032_s24 = smov %s2490_s29  ;;  %23 = sbr.rel (!%p21_p11) target bundleno = 9 (0x9), region = 109 }
 0x513   :  { %1879 = vsyncpa [#allocation5], 1 }
 0x514   :  { %1881 = vsyncpa [#allocation5 + $0x1], 1 }
 0x515   :  { %1882 = vsyncpa [#allocation8], 1 }
 0x516   :  { %1883 = vsyncpa [#allocation11], 1 }
 0x517   :  { %1884 = vsyncpa [#allocation6], 1 }
 0x518   :  { %1886 = vsyncpa [#allocation6 + $0x1], 1 }

</bundles_post_ra>
